<compile_context>
chip_gen: v6e
topology: v6e:2x2x1
jax: 0.10.0
libtpu: 0.0.40
codegen_flags: <defaults>
</compile_context>

<pallas_src>
import functools

import jax
import jax.numpy as jnp
from jax.experimental import pallas as pl
from jax.experimental.pallas import tpu as pltpu


def _round_up(x: int, m: int) -> int:
    return (x + m - 1) // m * m


# --------------------------------------------------------------------------
# Pass 1: masked per-sample max squared-norm of the embeddings (MSNN_new stats)
# --------------------------------------------------------------------------
def _maxnorm_kernel(x_ref, m_ref, w_ref, b_ref, out_ref, acc_ref):
    t = pl.program_id(2)

    @pl.when(t == 0)
    def _init():
        acc_ref[...] = jnp.zeros_like(acc_ref)          # squared norms are >= 0

    x = x_ref[0].astype(jnp.bfloat16)                                # (Cin_p, tP)
    emb = jnp.dot(w_ref[...], x, preferred_element_type=jnp.float32)  # (Dp, tP) f32
    emb = emb + b_ref[...]                                           # (Dp, 1) bias
    sq = jnp.sum(emb * emb, axis=0, keepdims=True)                   # (1, tP)
    sq = sq * m_ref[0].astype(jnp.float32)               # invalid / padded px -> 0
    acc_ref[...] = jnp.maximum(acc_ref[...], sq)         # per-lane running max (VPU)

    @pl.when(t == pl.num_programs(2) - 1)
    def _finalize():
        # One cross-lane (XLU) reduce per (sample, chunk), not per grid step.
        out_ref[...] = jnp.zeros_like(out_ref) + jnp.max(acc_ref[...])


# --------------------------------------------------------------------------
# Pass 2: fused conv + normalize + class logits + softmax (+ proj writeback)
# --------------------------------------------------------------------------
def _fused_kernel(scale_ref, x_ref, w_ref, b_ref, cn_ref, off_ref,
                  cprobs_ref, proj_ref):
    b = pl.program_id(0)
    s = scale_ref[b]                                 # SMEM scalar: 1/(max_norm*sqrt(c))

    x = x_ref[0].astype(jnp.bfloat16)                                # (Cin_p, tP)
    emb = jnp.dot(w_ref[...], x, preferred_element_type=jnp.float32)  # (Dp, tP) f32
    emb = (emb + b_ref[...]) * s                     # normalize + curvature rescale

    logits = jnp.dot(cn_ref[...], emb.astype(jnp.bfloat16),
                     preferred_element_type=jnp.float32)             # (Cp, tP) f32
    logits = logits + off_ref[...]                   # padded class rows carry -1e30

    m = jnp.max(logits, axis=0, keepdims=True)       # (1, tP) stable softmax (f32)
    e = jnp.exp(logits - m)                          # EUP
    denom = jnp.sum(e, axis=0, keepdims=True)
    probs = e * pl.reciprocal(denom, approx=True)    # ~1e-3 rel; flag if log() downstream

    cprobs_ref[0] = probs.astype(cprobs_ref.dtype)   # bf16 store (f32 math above)
    proj_ref[0] = emb.astype(proj_ref.dtype)         # proj written in bf16


# --------------------------------------------------------------------------
# Wrapper
# --------------------------------------------------------------------------
@functools.partial(jax.jit, static_argnames=("tile_p",))
def segmenter_forward(images, valid_mask, conv_w, conv_b, class_normals,
                      class_offsets, curvature, *, tile_p=2048):
    """Pallas implementation of Segmenter.forward().

    images:        (B, Cin, H, W) f32  (NCHW, like PyTorch)
    valid_mask:    (B, H, W) bool      (labels <= tree.M - 1)
    conv_w:        (D, Cin) f32        1x1-conv stand-in for embedding_model
    conv_b:        (D,) f32
    class_normals: (C, D) f32          Euclidean embedding-space normals
    class_offsets: (C,) f32
    curvature:     scalar f32

    Returns (cprobs (B, C, H, W) bf16, proj (B, D, H, W) bf16).
    """
    B, Cin, H, W = images.shape
    D, _ = conv_w.shape
    C, _ = class_normals.shape
    P = H * W

    # Lane tile: as large as allowed, but cap so the double-buffered image block
    # stays within a few MiB of VMEM whatever Cin is (default scoped limit safe).
    tp_cap = max(128, (4 * 1024 * 1024 // (4 * max(Cin, 1))) // 128 * 128)
    tp = _round_up(min(tile_p, tp_cap, _round_up(P, 128)), 128)
    P_pad = _round_up(P, tp)
    T = P_pad // tp

    # Channel padding to sublane minima only (NOT 128): the pixel axis is the lane
    # axis; D and C are sublane axes of the stores / M dims of the matmuls.
    Dp = _round_up(D, 16)            # bf16 sublane pack (proj store)
    Cp = _round_up(C, 16)            # bf16 sublane pack (cprobs store)

    # ---- layout glue: skip the pad/cast pass over the image when it already aligns ----
    x_aligned = (Cin % 8 == 0) and (P_pad == P)
    if x_aligned:
        Cin_p = Cin
        x = images.reshape(B, Cin, P)                 # f32; cast to bf16 in-kernel
    else:
        Cin_p = _round_up(Cin, 16)
        x = jnp.pad(images.reshape(B, Cin, P),
                    ((0, 0), (0, Cin_p - Cin), (0, P_pad - P))).astype(jnp.bfloat16)

    mask = valid_mask.reshape(B, 1, P).astype(jnp.bfloat16)   # bf16 mask: half the read
    if P_pad != P:
        mask = jnp.pad(mask, ((0, 0), (0, 0), (0, P_pad - P)))   # padded px invalid

    w = jnp.pad(conv_w, ((0, Dp - D), (0, Cin_p - Cin))).astype(jnp.bfloat16)
    bias = jnp.pad(conv_b, (0, Dp - D)).astype(jnp.float32).reshape(Dp, 1)
    cn = jnp.pad(class_normals, ((0, Cp - C), (0, Dp - D))).astype(jnp.bfloat16)
    off = jnp.pad(class_offsets, (0, Cp - C),
                  constant_values=-1e30).astype(jnp.float32).reshape(Cp, 1)

    # ---------------- pass 1: per-sample masked max squared norm ----------------
    # Pixel axis split into (chunk "parallel", inner "arbitrary") so v7x's two
    # TensorCores have work even at B = 1; partial maxes are combined below.
    n_chunks = 2 if (T >= 2 and T % 2 == 0) else 1
    T_inner = T // n_chunks

    max_part = pl.pallas_call(
        _maxnorm_kernel,
        out_shape=jax.ShapeDtypeStruct((B, n_chunks, 1, 128), jnp.float32),
        grid_spec=pltpu.PrefetchScalarGridSpec(
            num_scalar_prefetch=0,
            grid=(B, n_chunks, T_inner),               # reduction (pixel) axis last
            in_specs=[
                pl.BlockSpec((1, Cin_p, tp),
                             lambda b, c, t: (b, 0, c * T_inner + t)),
                pl.BlockSpec((1, 1, tp),
                             lambda b, c, t: (b, 0, c * T_inner + t)),
                pl.BlockSpec((Dp, Cin_p), lambda b, c, t: (0, 0)),   # weights resident
                pl.BlockSpec((Dp, 1), lambda b, c, t: (0, 0)),
            ],
            out_specs=pl.BlockSpec((1, 1, 1, 128), lambda b, c, t: (b, c, 0, 0)),
            scratch_shapes=[pltpu.VMEM((1, tp), jnp.float32)],       # per-lane max acc
        ),
        compiler_params=pltpu.CompilerParams(
            dimension_semantics=("parallel", "parallel", "arbitrary")),
    )(x, mask, w, bias)

    # Per-sample scale on (B,)-sized data; default 1.0 when no valid pixel, and
    # guard against a vanishing max norm (division-by-zero).
    max_sq = jnp.max(max_part, axis=(1, 2, 3))
    max_norm = jnp.where(max_sq > 0.0, jnp.sqrt(max_sq), 1.0)
    scale = (1.0 / (jnp.maximum(max_norm, 1e-12)
                    * jnp.sqrt(curvature.astype(jnp.float32)))).astype(jnp.float32)

    # ------------- pass 2: fused normalize + logits + softmax + proj -------------
    cprobs_pad, proj_pad = pl.pallas_call(
        _fused_kernel,
        out_shape=(
            jax.ShapeDtypeStruct((B, Cp, P_pad), jnp.bfloat16),
            jax.ShapeDtypeStruct((B, Dp, P_pad), jnp.bfloat16),
        ),
        grid_spec=pltpu.PrefetchScalarGridSpec(
            num_scalar_prefetch=1,                     # (B,) scale vector -> SMEM
            grid=(B, T),
            in_specs=[
                pl.BlockSpec((1, Cin_p, tp), lambda b, t, s: (b, 0, t)),
                pl.BlockSpec((Dp, Cin_p), lambda b, t, s: (0, 0)),
                pl.BlockSpec((Dp, 1), lambda b, t, s: (0, 0)),
                pl.BlockSpec((Cp, Dp), lambda b, t, s: (0, 0)),      # normals resident
                pl.BlockSpec((Cp, 1), lambda b, t, s: (0, 0)),
            ],
            out_specs=(
                pl.BlockSpec((1, Cp, tp), lambda b, t, s: (b, 0, t)),
                pl.BlockSpec((1, Dp, tp), lambda b, t, s: (b, 0, t)),
            ),
        ),
        compiler_params=pltpu.CompilerParams(
            dimension_semantics=("parallel", "parallel")),
    )(scale, x, w, bias, cn, off)

    # Strip only the padding that was actually added (no-op copies when aligned).
    cprobs = cprobs_pad if (Cp == C and P_pad == P) else cprobs_pad[:, :C, :P]
    proj = proj_pad if (Dp == D and P_pad == P) else proj_pad[:, :D, :P]
    return cprobs.reshape(B, C, H, W), proj.reshape(B, D, H, W)


# --------------------------------------------------------------------------
# Pure-JAX reference (same bf16 rounding of matmul inputs) for verification.
# --------------------------------------------------------------------------
def _reference_forward(images, valid_mask, conv_w, conv_b, class_normals,
                       class_offsets, curvature):
    B, Cin, H, W = images.shape
    x = images.reshape(B, Cin, H * W).astype(jnp.bfloat16).astype(jnp.float32)
    w = conv_w.astype(jnp.bfloat16).astype(jnp.float32)
    emb = jnp.einsum("dc,bcp->bdp", w, x) + conv_b[None, :, None]
    sq = jnp.sum(emb * emb, axis=1)
    m = valid_mask.reshape(B, -1)
    max_sq = jnp.max(jnp.where(m, sq, 0.0), axis=1)
    max_norm = jnp.where(max_sq > 0.0, jnp.sqrt(max_sq), 1.0)
    scale = 1.0 / (jnp.maximum(max_norm, 1e-12) * jnp.sqrt(curvature))
    norm_emb = emb * scale[:, None, None]
    cn = class_normals.astype(jnp.bfloat16).astype(jnp.float32)
    logits = jnp.einsum("kd,bdp->bkp", cn,
                        norm_emb.astype(jnp.bfloat16).astype(jnp.float32))
    logits = logits + class_offsets[None, :, None]
    probs = jax.nn.softmax(logits, axis=1)
    return (probs.reshape(B, -1, H, W),
            norm_emb.astype(jnp.bfloat16).reshape(B, -1, H, W))


if __name__ == "__main__":
    key = jax.random.PRNGKey(0)
    kx, kl, kw, kb, kn, ko = jax.random.split(key, 6)

    B, Cin, H, W = 2, 4, 32, 32     # images (NCHW)
    D = 32                          # EFN_OUT_DIM (embedding dim)
    C = 21                          # num_classes (pascal)
    curvature = jnp.float32(1.0)

    images = jax.random.normal(kx, (B, Cin, H, W), jnp.float32)
    labels = jax.random.randint(kl, (B, H, W), 0, C + 5)   # some pixels "ignore"
    valid_mask = labels <= C - 1                            # labels <= tree.M - 1
    conv_w = jax.random.normal(kw, (D, Cin), jnp.float32) * 0.5
    conv_b = jax.random.normal(kb, (D,), jnp.float32) * 0.1
    class_normals = jax.random.normal(kn, (C, D), jnp.float32) * 0.5
    class_offsets = jax.random.normal(ko, (C,), jnp.float32) * 0.1

    cprobs, proj = segmenter_forward(images, valid_mask, conv_w, conv_b,
                                     class_normals, class_offsets, curvature)
    jax.block_until_ready((cprobs, proj))

    ref_cprobs, ref_proj = _reference_forward(images, valid_mask, conv_w, conv_b,
                                              class_normals, class_offsets,
                                              curvature)
    assert cprobs.shape == (B, C, H, W) and proj.shape == (B, D, H, W)
    assert bool(jnp.allclose(cprobs.astype(jnp.float32), ref_cprobs, atol=2e-2))
    assert bool(jnp.allclose(proj.astype(jnp.float32),
                             ref_proj.astype(jnp.float32), atol=2e-2))
    print("KERNEL_OK")
</pallas_src>

<mosaic_0001>
module attributes {stable_mosaic.version = 11 : i64} {
  func.func @_maxnorm_kernel(%arg0: i32, %arg1: i32, %arg2: i32, %arg3: memref<1x16x1024xbf16, #tpu.memory_space<vmem>>, %arg4: memref<1x1x1024xbf16, #tpu.memory_space<vmem>>, %arg5: memref<32x16xbf16, #tpu.memory_space<vmem>>, %arg6: memref<32x1xf32, #tpu.memory_space<vmem>>, %arg7: memref<1x1x1x128xf32, #tpu.memory_space<vmem>>, %arg8: memref<1x1024xf32, #tpu.memory_space<vmem>>) attributes {dimension_semantics = [#tpu.dimension_semantics<parallel>, #tpu.dimension_semantics<parallel>, #tpu.dimension_semantics<arbitrary>], iteration_bounds = array<i64: 2, 1, 1>, scalar_prefetch = 0 : i64, scratch_operands = 1 : i64, tpu.core_type = #tpu.core_type<tc>, window_params = [{transform_indices = @transform_0, window_bounds = array<i64: 1, 16, 1024>}, {transform_indices = @transform_1, window_bounds = array<i64: 1, 1, 1024>}, {pipeline_mode = #tpu.pipeline_mode<synchronous>, transform_indices = @transform_2, window_bounds = array<i64: 32, 16>}, {pipeline_mode = #tpu.pipeline_mode<synchronous>, transform_indices = @transform_3, window_bounds = array<i64: 32, 1>}, {transform_indices = @transform_4, window_bounds = array<i64: 1, 1, 1, 128>}]} {
    %c0_i32 = arith.constant 0 : i32
    %0 = arith.cmpi eq, %arg2, %c0_i32 : i32
    %1 = arith.extui %0 : i1 to i32
    %c0_i32_0 = arith.constant 0 : i32
    %2 = arith.cmpi ne, %1, %c0_i32_0 : i32
    scf.if %2 {
      %cst_17 = arith.constant 0.000000e+00 : f32
      %23 = vector.broadcast %cst_17 : f32 to vector<1x1024xf32>
      %c0_18 = arith.constant 0 : index
      %c0_19 = arith.constant 0 : index
      %24 = vector.load %arg8[%c0_18, %c0_19] : memref<1x1024xf32, #tpu.memory_space<vmem>>, vector<1x1024xf32>
      tpu.vector_store %arg8[%c0_18, %c0_19], %23 {strides = array<i32>} : memref<1x1024xf32, #tpu.memory_space<vmem>>, vector<1x1024xf32>,
    } else {
    }
    %c0 = arith.constant 0 : index
    %c0_1 = arith.constant 0 : index
    %c0_2 = arith.constant 0 : index
    %3 = vector.load %arg3[%c0, %c0_1, %c0_2] : memref<1x16x1024xbf16, #tpu.memory_space<vmem>>, vector<1x16x1024xbf16>
    %4 = vector.shape_cast %3 : vector<1x16x1024xbf16> to vector<16x1024xbf16>
    %c0_3 = arith.constant 0 : index
    %c0_4 = arith.constant 0 : index
    %5 = vector.load %arg5[%c0_3, %c0_4] : memref<32x16xbf16, #tpu.memory_space<vmem>>, vector<32x16xbf16>
    %cst = arith.constant dense<0.000000e+00> : vector<32x1024xf32>
    %6 = tpu.matmul %5, %4, %cst {dimension_numbers = #tpu.dot_dimension_numbers<[1], [0], [0], [1], [0, 0, 1, 1], [], []>} : vector<32x16xbf16>, vector<16x1024xbf16>, vector<32x1024xf32> -> vector<32x1024xf32>
    %c0_5 = arith.constant 0 : index
    %c0_6 = arith.constant 0 : index
    %7 = vector.load %arg6[%c0_5, %c0_6] : memref<32x1xf32, #tpu.memory_space<vmem>>, vector<32x1xf32>
    %8 = vector.broadcast %7 : vector<32x1xf32> to vector<32x1024xf32>
    %9 = arith.addf %6, %8 : vector<32x1024xf32>
    %10 = arith.mulf %9, %9 : vector<32x1024xf32>
    %cst_7 = arith.constant dense<0.000000e+00> : vector<1024xf32>
    %11 = vector.multi_reduction <add>, %10, %cst_7 [0] : vector<32x1024xf32> to vector<1024xf32>
    %12 = vector.shape_cast %11 : vector<1024xf32> to vector<1x1024xf32>
    %c0_8 = arith.constant 0 : index
    %c0_9 = arith.constant 0 : index
    %c0_10 = arith.constant 0 : index
    %13 = vector.load %arg4[%c0_8, %c0_9, %c0_10] : memref<1x1x1024xbf16, #tpu.memory_space<vmem>>, vector<1x1x1024xbf16>
    %14 = vector.shape_cast %13 : vector<1x1x1024xbf16> to vector<1x1024xbf16>
    %15 = arith.extf %14 : vector<1x1024xbf16> to vector<1x1024xf32>
    %16 = arith.mulf %12, %15 : vector<1x1024xf32>
    %c0_11 = arith.constant 0 : index
    %c0_12 = arith.constant 0 : index
    %17 = vector.load %arg8[%c0_11, %c0_12] : memref<1x1024xf32, #tpu.memory_space<vmem>>, vector<1x1024xf32>
    %18 = arith.maximumf %17, %16 : vector<1x1024xf32>
    %c0_13 = arith.constant 0 : index
    %c0_14 = arith.constant 0 : index
    %19 = vector.load %arg8[%c0_13, %c0_14] : memref<1x1024xf32, #tpu.memory_space<vmem>>, vector<1x1024xf32>
    tpu.vector_store %arg8[%c0_13, %c0_14], %18 {strides = array<i32>} : memref<1x1024xf32, #tpu.memory_space<vmem>>, vector<1x1024xf32>,
    %c0_i32_15 = arith.constant 0 : i32
    %20 = arith.cmpi eq, %arg2, %c0_i32_15 : i32
    %21 = arith.extui %20 : i1 to i32
    %c0_i32_16 = arith.constant 0 : i32
    %22 = arith.cmpi ne, %21, %c0_i32_16 : i32
    scf.if %22 {
      %cst_17 = arith.constant 0.000000e+00 : f32
      %23 = vector.broadcast %cst_17 : f32 to vector<1x1x1x128xf32>
      %c0_18 = arith.constant 0 : index
      %c0_19 = arith.constant 0 : index
      %24 = vector.load %arg8[%c0_18, %c0_19] : memref<1x1024xf32, #tpu.memory_space<vmem>>, vector<1x1024xf32>
      %25 = vector.shape_cast %24 : vector<1x1024xf32> to vector<1x1x1024xf32>
      %cst_20 = arith.constant dense<0xFF800000> : vector<1xf32>
      %26 = vector.multi_reduction <maximumf>, %25, %cst_20 [1, 2] : vector<1x1x1024xf32> to vector<1xf32>
      %27 = vector.shape_cast %26 : vector<1xf32> to vector<1x1x1xf32>
      %28 = vector.extract %27[0, 0, 0] : f32 from vector<1x1x1xf32>
      %29 = vector.broadcast %28 : f32 to vector<1x1x1x128xf32>
      %30 = arith.addf %23, %29 : vector<1x1x1x128xf32>
      %c0_21 = arith.constant 0 : index
      %c0_22 = arith.constant 0 : index
      %c0_23 = arith.constant 0 : index
      %c0_24 = arith.constant 0 : index
      %31 = vector.load %arg7[%c0_21, %c0_22, %c0_23, %c0_24] : memref<1x1x1x128xf32, #tpu.memory_space<vmem>>, vector<1x1x1x128xf32>
      tpu.vector_store %arg7[%c0_21, %c0_22, %c0_23, %c0_24], %30 {strides = array<i32>} : memref<1x1x1x128xf32, #tpu.memory_space<vmem>>, vector<1x1x1x128xf32>,
    } else {
    }
    return
  }
  func.func @transform_0(%arg0: i32, %arg1: i32, %arg2: i32) -> (i32, i32, i32) {
    %c1_i32 = arith.constant 1 : i32
    %0 = arith.muli %arg1, %c1_i32 : i32
    %1 = arith.addi %0, %arg2 : i32
    %c0_i32 = arith.constant 0 : i32
    %c0_i32_0 = arith.constant 0 : i32
    return %arg0, %c0_i32, %1 : i32, i32, i32
  }
  func.func @transform_1(%arg0: i32, %arg1: i32, %arg2: i32) -> (i32, i32, i32) {
    %c1_i32 = arith.constant 1 : i32
    %0 = arith.muli %arg1, %c1_i32 : i32
    %1 = arith.addi %0, %arg2 : i32
    %c0_i32 = arith.constant 0 : i32
    %c0_i32_0 = arith.constant 0 : i32
    return %arg0, %c0_i32, %1 : i32, i32, i32
  }
  func.func @transform_2(%arg0: i32, %arg1: i32, %arg2: i32) -> (i32, i32) {
    %c0_i32 = arith.constant 0 : i32
    %c0_i32_0 = arith.constant 0 : i32
    %c0_i32_1 = arith.constant 0 : i32
    return %c0_i32, %c0_i32_0 : i32, i32
  }
  func.func @transform_3(%arg0: i32, %arg1: i32, %arg2: i32) -> (i32, i32) {
    %c0_i32 = arith.constant 0 : i32
    %c0_i32_0 = arith.constant 0 : i32
    %c0_i32_1 = arith.constant 0 : i32
    return %c0_i32, %c0_i32_0 : i32, i32
  }
  func.func @transform_4(%arg0: i32, %arg1: i32, %arg2: i32) -> (i32, i32, i32, i32) {
    %c0_i32 = arith.constant 0 : i32
    %c0_i32_0 = arith.constant 0 : i32
    %c0_i32_1 = arith.constant 0 : i32
    return %arg0, %arg1, %c0_i32, %c0_i32_0 : i32, i32, i32, i32
  }
}

module attributes {stable_mosaic.version = 11 : i64} {
  func.func @_fused_kernel(%arg0: i32, %arg1: i32, %arg2: memref<2xf32, #tpu.memory_space<smem>>, %arg3: memref<1x16x1024xbf16, #tpu.memory_space<vmem>>, %arg4: memref<32x16xbf16, #tpu.memory_space<vmem>>, %arg5: memref<32x1xf32, #tpu.memory_space<vmem>>, %arg6: memref<32x32xbf16, #tpu.memory_space<vmem>>, %arg7: memref<32x1xf32, #tpu.memory_space<vmem>>, %arg8: memref<1x32x1024xbf16, #tpu.memory_space<vmem>>, %arg9: memref<1x32x1024xbf16, #tpu.memory_space<vmem>>) attributes {dimension_semantics = [#tpu.dimension_semantics<parallel>, #tpu.dimension_semantics<parallel>], iteration_bounds = array<i64: 2, 1>, scalar_prefetch = 1 : i64, scratch_operands = 0 : i64, tpu.core_type = #tpu.core_type<tc>, window_params = [{transform_indices = @transform_0, window_bounds = array<i64: 1, 16, 1024>}, {pipeline_mode = #tpu.pipeline_mode<synchronous>, transform_indices = @transform_1, window_bounds = array<i64: 32, 16>}, {pipeline_mode = #tpu.pipeline_mode<synchronous>, transform_indices = @transform_2, window_bounds = array<i64: 32, 1>}, {pipeline_mode = #tpu.pipeline_mode<synchronous>, transform_indices = @transform_3, window_bounds = array<i64: 32, 32>}, {pipeline_mode = #tpu.pipeline_mode<synchronous>, transform_indices = @transform_4, window_bounds = array<i64: 32, 1>}, {transform_indices = @transform_5, window_bounds = array<i64: 1, 32, 1024>}, {transform_indices = @transform_6, window_bounds = array<i64: 1, 32, 1024>}]} {
    %0 = arith.index_cast %arg0 : i32 to index
    %1 = memref.load %arg2[%0] : memref<2xf32, #tpu.memory_space<smem>>
    %c0 = arith.constant 0 : index
    %c0_0 = arith.constant 0 : index
    %c0_1 = arith.constant 0 : index
    %2 = vector.load %arg3[%c0, %c0_0, %c0_1] : memref<1x16x1024xbf16, #tpu.memory_space<vmem>>, vector<1x16x1024xbf16>
    %3 = vector.shape_cast %2 : vector<1x16x1024xbf16> to vector<16x1024xbf16>
    %c0_2 = arith.constant 0 : index
    %c0_3 = arith.constant 0 : index
    %4 = vector.load %arg4[%c0_2, %c0_3] : memref<32x16xbf16, #tpu.memory_space<vmem>>, vector<32x16xbf16>
    %cst = arith.constant dense<0.000000e+00> : vector<32x1024xf32>
    %5 = tpu.matmul %4, %3, %cst {dimension_numbers = #tpu.dot_dimension_numbers<[1], [0], [0], [1], [0, 0, 1, 1], [], []>} : vector<32x16xbf16>, vector<16x1024xbf16>, vector<32x1024xf32> -> vector<32x1024xf32>
    %c0_4 = arith.constant 0 : index
    %c0_5 = arith.constant 0 : index
    %6 = vector.load %arg5[%c0_4, %c0_5] : memref<32x1xf32, #tpu.memory_space<vmem>>, vector<32x1xf32>
    %7 = vector.broadcast %6 : vector<32x1xf32> to vector<32x1024xf32>
    %8 = arith.addf %5, %7 : vector<32x1024xf32>
    %9 = vector.broadcast %1 : f32 to vector<32x1024xf32>
    %10 = arith.mulf %8, %9 : vector<32x1024xf32>
    %c0_6 = arith.constant 0 : index
    %c0_7 = arith.constant 0 : index
    %11 = vector.load %arg6[%c0_6, %c0_7] : memref<32x32xbf16, #tpu.memory_space<vmem>>, vector<32x32xbf16>
    %12 = arith.truncf %10 : vector<32x1024xf32> to vector<32x1024xbf16>
    %cst_8 = arith.constant dense<0.000000e+00> : vector<32x1024xf32>
    %13 = tpu.matmul %11, %12, %cst_8 {dimension_numbers = #tpu.dot_dimension_numbers<[1], [0], [0], [1], [0, 0, 1, 1], [], []>} : vector<32x32xbf16>, vector<32x1024xbf16>, vector<32x1024xf32> -> vector<32x1024xf32>
    %c0_9 = arith.constant 0 : index
    %c0_10 = arith.constant 0 : index
    %14 = vector.load %arg7[%c0_9, %c0_10] : memref<32x1xf32, #tpu.memory_space<vmem>>, vector<32x1xf32>
    %15 = vector.broadcast %14 : vector<32x1xf32> to vector<32x1024xf32>
    %16 = arith.addf %13, %15 : vector<32x1024xf32>
    %cst_11 = arith.constant dense<0xFF800000> : vector<1024xf32>
    %17 = vector.multi_reduction <maximumf>, %16, %cst_11 [0] : vector<32x1024xf32> to vector<1024xf32>
    %18 = vector.shape_cast %17 : vector<1024xf32> to vector<1x1024xf32>
    %19 = vector.broadcast %18 : vector<1x1024xf32> to vector<32x1024xf32>
    %20 = arith.subf %16, %19 : vector<32x1024xf32>
    %21 = math.exp %20 : vector<32x1024xf32>
    %cst_12 = arith.constant dense<0.000000e+00> : vector<1024xf32>
    %22 = vector.multi_reduction <add>, %21, %cst_12 [0] : vector<32x1024xf32> to vector<1024xf32>
    %23 = vector.shape_cast %22 : vector<1024xf32> to vector<1x1024xf32>
    %24 = tpu.reciprocal %23 {approx = true} : vector<1x1024xf32> -> vector<1x1024xf32>
    %25 = vector.broadcast %24 : vector<1x1024xf32> to vector<32x1024xf32>
    %26 = arith.mulf %21, %25 : vector<32x1024xf32>
    %27 = arith.truncf %26 : vector<32x1024xf32> to vector<32x1024xbf16>
    %c0_13 = arith.constant 0 : index
    %c0_14 = arith.constant 0 : index
    %c0_15 = arith.constant 0 : index
    %28 = vector.load %arg8[%c0_13, %c0_14, %c0_15] : memref<1x32x1024xbf16, #tpu.memory_space<vmem>>, vector<1x32x1024xbf16>
    %29 = vector.shape_cast %28 : vector<1x32x1024xbf16> to vector<32x1024xbf16>
    %30 = vector.shape_cast %27 : vector<32x1024xbf16> to vector<1x32x1024xbf16>
    tpu.vector_store %arg8[%c0_13, %c0_14, %c0_15], %30 {strides = array<i32>} : memref<1x32x1024xbf16, #tpu.memory_space<vmem>>, vector<1x32x1024xbf16>,
    %31 = arith.truncf %10 : vector<32x1024xf32> to vector<32x1024xbf16>
    %c0_16 = arith.constant 0 : index
    %c0_17 = arith.constant 0 : index
    %c0_18 = arith.constant 0 : index
    %32 = vector.load %arg9[%c0_16, %c0_17, %c0_18] : memref<1x32x1024xbf16, #tpu.memory_space<vmem>>, vector<1x32x1024xbf16>
    %33 = vector.shape_cast %32 : vector<1x32x1024xbf16> to vector<32x1024xbf16>
    %34 = vector.shape_cast %31 : vector<32x1024xbf16> to vector<1x32x1024xbf16>
    tpu.vector_store %arg9[%c0_16, %c0_17, %c0_18], %34 {strides = array<i32>} : memref<1x32x1024xbf16, #tpu.memory_space<vmem>>, vector<1x32x1024xbf16>,
    return
  }
  func.func @transform_0(%arg0: i32, %arg1: i32, %arg2: memref<2xf32, #tpu.memory_space<smem>>) -> (i32, i32, i32) {
    %c0_i32 = arith.constant 0 : i32
    %c0_i32_0 = arith.constant 0 : i32
    return %arg0, %c0_i32, %arg1 : i32, i32, i32
  }
  func.func @transform_1(%arg0: i32, %arg1: i32, %arg2: memref<2xf32, #tpu.memory_space<smem>>) -> (i32, i32) {
    %c0_i32 = arith.constant 0 : i32
    %c0_i32_0 = arith.constant 0 : i32
    %c0_i32_1 = arith.constant 0 : i32
    return %c0_i32, %c0_i32_0 : i32, i32
  }
  func.func @transform_2(%arg0: i32, %arg1: i32, %arg2: memref<2xf32, #tpu.memory_space<smem>>) -> (i32, i32) {
    %c0_i32 = arith.constant 0 : i32
    %c0_i32_0 = arith.constant 0 : i32
    %c0_i32_1 = arith.constant 0 : i32
    return %c0_i32, %c0_i32_0 : i32, i32
  }
  func.func @transform_3(%arg0: i32, %arg1: i32, %arg2: memref<2xf32, #tpu.memory_space<smem>>) -> (i32, i32) {
    %c0_i32 = arith.constant 0 : i32
    %c0_i32_0 = arith.constant 0 : i32
    %c0_i32_1 = arith.constant 0 : i32
    return %c0_i32, %c0_i32_0 : i32, i32
  }
  func.func @transform_4(%arg0: i32, %arg1: i32, %arg2: memref<2xf32, #tpu.memory_space<smem>>) -> (i32, i32) {
    %c0_i32 = arith.constant 0 : i32
    %c0_i32_0 = arith.constant 0 : i32
    %c0_i32_1 = arith.constant 0 : i32
    return %c0_i32, %c0_i32_0 : i32, i32
  }
  func.func @transform_5(%arg0: i32, %arg1: i32, %arg2: memref<2xf32, #tpu.memory_space<smem>>) -> (i32, i32, i32) {
    %c0_i32 = arith.constant 0 : i32
    %c0_i32_0 = arith.constant 0 : i32
    return %arg0, %c0_i32, %arg1 : i32, i32, i32
  }
  func.func @transform_6(%arg0: i32, %arg1: i32, %arg2: memref<2xf32, #tpu.memory_space<smem>>) -> (i32, i32, i32) {
    %c0_i32 = arith.constant 0 : i32
    %c0_i32_0 = arith.constant 0 : i32
    return %arg0, %c0_i32, %arg1 : i32, i32, i32
  }
}

</mosaic_0001>

<bundles_post_ra>
// kernel: segmenter_forward.2
= control target key start
LH: loop header
LB: loop body
LE: loop exit
PB: predicated region body
PF: predicated region fallthrough
CT: control target
= control target key end

     0   :  { %s1087_s15 = smov 0   ;;  %s1089_s16 = smov 0   ;;  %s1249_s0 = inlined_call_operand.vmem [shape: bf16[2,16,1024], index: 0, kind: input, shape index: {}]   ;;  %s1250_s1 = inlined_call_operand.vmem [shape: bf16[2,1,1024], index: 1, kind: input, shape index: {}]   ;;  %s1251_s2 = inlined_call_operand.vmem [shape: bf16[32,16], index: 2, kind: input, shape index: {}]   ;;  %s1252_s3 = inlined_call_operand.vmem [shape: f32[32,1], index: 3, kind: input, shape index: {}]   ;;  %s1253_s4 = inlined_call_operand.vmem [shape: f32[2,1,1,128], index: 4, kind: output, shape index: {}]  }
   0x1   :  { %s1091_s17 = smov 0  }
   0x2 LB: > { %s33_s18 = sadd.s32 1, %s1054_s16  ;;  %p979_p0 = scmp.ge.s32.totalorder %s1058_s17, 1  ;;  %s1058_s17 = sphi %s1091_s17, %s14_s17   ;;  %s1054_s16 = sphi %s1089_s16, %s1255_s16   ;;  %s1050_s15 = sphi %s1087_s15, %s1254_s15  }
   0x3   : > { %p35_p1 = scmp.ge.s32.totalorder %s33_s18, 2  ;;  %p214_p2 = scmp.lt.s32.totalorder %s1058_s17, 3 }
   0x5   : > { %s1257_s18 = smov (%p35_p1, %s33_s18), 0  ;;  %p215_p3 = pnand %p979_p0, %p214_p2 }
   0x6   : > { %p257_p4 = scmp.lt.s32.totalorder (!%p215_p3), %s1050_s15, 1 }
   0x7   : > { %218 = sbr.rel (%p215_p3) target bundleno = 491 (0x1eb), region = 36 }
   0xc   : > { %v1060_v0 = vmov 0   ;;  %s1259_s15 = smov (!%p257_p4, %s1050_s15), 1  ;;  %v302_v1 = vld [vmem:[%s1252_s3] sm:$0xff]  ;;  %v304_v2 = vld [vmem:[%s1252_s3 + $0x10] sm:$0xff]  ;;  %v303_v3 = vld [vmem:[%s1252_s3 + $0x8] sm:$0xff]  ;;  %vm376_vm0 = vcmask 130048   ;;  %v704_v35 = vlaneseq }
   0xd   : > { %415 = vmatprep.mubr.bf16.mxu0 %v1060_v0  ;;  %468 = vmatprep.mubr.bf16.mxu1 %v1060_v0  ;;  %s1003_s23 = sshll.u32 %s1259_s15, 6  ;;  %v305_v4 = vld [vmem:[%s1252_s3 + $0x18] sm:$0xff]  ;;  %v1034_v18 = vld [vmem:[%s1251_s2] sm:$0xff]   ;;  %v1035_v22 = vld [vmem:[%s1251_s2 + $0x8] sm:$0xff]   ;;  %s982_s9 = sshll.u32 %s1259_s15, 3  ;;  %vm858_vm1 = vcmask 1040384  }
   0xe   : > { %1032 = vset.pattern.permute.xlu0 %v1060_v0  ;;  %1033 = vset.pattern.permute.xlu1 %v1060_v0  ;;  %s264_s28 = scalar_lea.vmem %s1249_s0, %s1003_s23  ;;  %v1156_v51 = vshrl.u32 %v704_v35, 7  ;;  %s275_s12 = scalar_lea.vmem %s1250_s1, %s982_s9 }
   0xf   : > { %308 = vperm.xlu0 %1032, %v302_v1   ;;  %318 = vperm.xlu1 %1033, %v304_v2   ;;  %v290_v5 = vld [vmem:[%s264_s28] sm:$0xff]  ;;  %v291_v7 = vld [vmem:[%s264_s28 + $0x8] sm:$0xff]  ;;  %v292_v11 = vld [vmem:[%s264_s28 + $0x10] sm:$0xff]  ;;  %s283_s19 = scalar_lea.vmem %s1253_s4, %s1259_s15 }
  0x10   : > { %v294_v6 = vld [vmem:[%s264_s28 + $0x20] sm:$0xff]  ;;  %v295_v9 = vld [vmem:[%s264_s28 + $0x28] sm:$0xff]  ;;  %v296_v12 = vld [vmem:[%s264_s28 + $0x30] sm:$0xff] }
  0x11   : > { %v986_v8 = vcombine.high %v290_v5, %v294_v6  ;;  %v985_v10 = vcombine.low %v290_v5, %v294_v6  ;;  %v988_v13 = vcombine.high %v291_v7, %v295_v9  ;;  %v987_v14 = vcombine.low %v291_v7, %v295_v9  ;;  %v293_v16 = vld [vmem:[%s264_s28 + $0x18] sm:$0xff]  ;;  %v1164_v6 = vld [vmem:[%s275_s12] sm:$0xff] }
  0x12   : > { %v990_v15 = vcombine.high %v292_v11, %v296_v12  ;;  %v297_v17 = vld [vmem:[%s264_s28 + $0x38] sm:$0xff]  ;;  %v989_v20 = vcombine.low %v292_v11, %v296_v12 }
  0x13   : > { %313 = vperm.xlu0 %1032, %v303_v3   ;;  %323 = vperm.xlu1 %1033, %v305_v4   ;;  %v992_v19 = vcombine.high %v293_v16, %v297_v17  ;;  %v991_v21 = vcombine.low %v293_v16, %v297_v17 }
  0x14   : > { %397 = vmatprep.subr.bf16.mxu0 %v986_v8  ;;  %450 = vmatprep.subr.bf16.mxu1 %v988_v13 }
  0x15   : > { %398 = vmatpush1.bf16.msra.mxu0 %v985_v10  ;;  %451 = vmatpush1.bf16.msra.mxu1 %v987_v14 }
  0x16   : > { %503 = vmatprep.subr.bf16.mxu0 %v990_v15  ;;  %556 = vmatprep.subr.bf16.mxu1 %v992_v19 }
  0x18   : > { %993 = vmatmul.mubr.msk.bf16.vlgmr.msra.gmra.mxu0 %vm376_vm0, %v1034_v18  ;;  %995 = vmatmul.mubr.msk.bf16.vlgmr.msra.gmra.mxu1 %vm376_vm0, %v1034_v18 }
  0x19   : > { %504 = vmatpush1.bf16.msra.mxu0 %v989_v20  ;;  %557 = vmatpush1.bf16.msra.mxu1 %v991_v21  ;;  %v1170_v21 = vunpack.c.l.bf16 %v1164_v6 }
  0x1a   : > { %425 = vmatprep.mubr.bf16.mxu0 %v1060_v0  ;;  %478 = vmatprep.mubr.bf16.mxu1 %v1060_v0 }
  0x20   : > { %994 = vmatmul.mubr.msk.bf16.gmra.mxu0 %vm376_vm0, %v1035_v22  ;;  %996 = vmatmul.mubr.msk.bf16.gmra.mxu1 %vm376_vm0, %v1035_v22 }
  0x21   : > { %521 = vmatprep.mubr.bf16.mxu0 %v1060_v0  ;;  %574 = vmatprep.mubr.bf16.mxu1 %v1060_v0 }
  0x28   : > { %997 = vmatmul.mubr.msk.bf16.vlgmr.msra.gmra.mxu0 %vm376_vm0, %v1034_v18  ;;  %999 = vmatmul.mubr.msk.bf16.vlgmr.msra.gmra.mxu1 %vm376_vm0, %v1034_v18 }
  0x29   : > { %531 = vmatprep.mubr.bf16.mxu0 %v1060_v0  ;;  %584 = vmatprep.mubr.bf16.mxu1 %v1060_v0 }
  0x30   : > { %998 = vmatmul.mubr.msk.bf16.gmra.mxu0 %vm376_vm0, %v1035_v22  ;;  %1000 = vmatmul.mubr.msk.bf16.gmra.mxu1 %vm376_vm0, %v1035_v22 }
  0x8a   : > { %v1137_v23 = vpop.permute.xlu0 %308  ;;  %v1141_v30 = vpop.permute.xlu1 %318 }
  0x8e   : > { %v1139_v27 = vpop.permute.xlu0 %313  ;;  %v1154_v50 = vpop.permute.xlu1 %323 }
  0xd8   : > { %v417_v24 = vpop.f32.mrf.mxu0  ;;  %v470_v25 = vpop.f32.mrf.mxu1 }
  0xd9   : > { %v418_v36 = vadd.f32 %v417_v24, %v1137_v23  ;;  %v471_v39 = vadd.f32 %v470_v25, %v1137_v23 }
  0xda   : > { %v419_v26 = vpop.f32.mrf.mxu0  ;;  %v472_v28 = vpop.f32.mrf.mxu1 }
  0xdb   : > { %v420_v42 = vadd.f32 %v419_v26, %v1137_v23  ;;  %v473_v46 = vadd.f32 %v472_v28, %v1137_v23  ;;  %v595_v52 = vmul.f32 %v418_v36, %v418_v36  ;;  %v597_v57 = vmul.f32 %v471_v39, %v471_v39 }
  0xdc   : > { %v421_v29 = vpop.f32.mrf.mxu0  ;;  %v474_v32 = vpop.f32.mrf.mxu1  ;;  %v1173_v26 = vsub.s32 0, %v1156_v51 }
  0xdd   : > { %v422_v31 = vadd.f32 %v421_v29, %v1139_v27  ;;  %v475_v33 = vadd.f32 %v474_v32, %v1139_v27  ;;  %v596_v62 = vmul.f32 %v420_v42, %v420_v42  ;;  %v598_v3 = vmul.f32 %v473_v46, %v473_v46 }
  0xde   : > { %v423_v34 = vpop.f32.mrf.mxu0  ;;  %v476_v38 = vpop.f32.mrf.mxu1  ;;  %v1181_v42 = vsub.s32 2, %v1156_v51 }
  0xdf   : > { %v424_v37 = vadd.f32 %v423_v34, %v1139_v27  ;;  %v477_v40 = vadd.f32 %v476_v38, %v1139_v27  ;;  %v603_v43 = vmul.f32 %v422_v31, %v422_v31  ;;  %v605_v47 = vmul.f32 %v475_v33, %v475_v33 }
  0xe0   : > { %v427_v41 = vpop.f32.mrf.mxu0  ;;  %v480_v45 = vpop.f32.mrf.mxu1  ;;  %v1176_v38 = vsub.s32 4, %v1156_v51 }
  0xe1   : > { %v428_v44 = vadd.f32 %v427_v41, %v1141_v30  ;;  %v481_v48 = vadd.f32 %v480_v45, %v1141_v30  ;;  %v604_v53 = vmul.f32 %v424_v37, %v424_v37  ;;  %v606_v58 = vmul.f32 %v477_v40, %v477_v40 }
  0xe2   : > { %v429_v49 = vpop.f32.mrf.mxu0  ;;  %v482_v56 = vpop.f32.mrf.mxu1  ;;  %v627_v63 = vadd.f32 %v603_v43, %v595_v52  ;;  %v645_v4 = vadd.f32 %v605_v47, %v597_v57  ;;  %v707_v41 = vrot.slane %v1170_v21, %v1173_v26  ;;  %v1188_v57 = vsub.s32 6, %v1156_v51 }
  0xe3   : > { %v611_v54 = vmul.f32 %v428_v44, %v428_v44  ;;  %v430_v55 = vadd.f32 %v429_v49, %v1141_v30  ;;  %v613_v59 = vmul.f32 %v481_v48, %v481_v48  ;;  %v483_v60 = vadd.f32 %v482_v56, %v1141_v30 }
  0xe4   : > { %v431_v61 = vpop.f32.mrf.mxu0  ;;  %v484_v2 = vpop.f32.mrf.mxu1  ;;  %v636_v9 = vadd.f32 %v604_v53, %v596_v62  ;;  %v654_v14 = vadd.f32 %v606_v58, %v598_v3 }
  0xe5   : > { %v612_v0 = vmul.f32 %v430_v55, %v430_v55  ;;  %v432_v1 = vadd.f32 %v431_v61, %v1154_v50  ;;  %v614_v5 = vmul.f32 %v483_v60, %v483_v60  ;;  %v485_v7 = vadd.f32 %v484_v2, %v1154_v50 }
  0xe6   : > { %v433_v8 = vpop.f32.mrf.mxu0  ;;  %v628_v10 = vadd.f32 %v627_v63, %v611_v54  ;;  %v486_v13 = vpop.f32.mrf.mxu1  ;;  %v646_v15 = vadd.f32 %v645_v4, %v613_v59  ;;  %v1061_v63 = vmov 1966171168  }
  0xe7   : > { %v619_v11 = vmul.f32 %v432_v1, %v432_v1  ;;  %v434_v12 = vadd.f32 %v433_v8, %v1154_v50  ;;  %v621_v16 = vmul.f32 %v485_v7, %v485_v7  ;;  %v487_v17 = vadd.f32 %v486_v13, %v1154_v50 }
  0xe8   : > { %v523_v18 = vpop.f32.mrf.mxu0  ;;  %v637_v19 = vadd.f32 %v636_v9, %v612_v0  ;;  %v576_v24 = vpop.f32.mrf.mxu1  ;;  %v655_v25 = vadd.f32 %v654_v14, %v614_v5  ;;  %v1193_v0 = vunpack.c.l.s4 %v1061_v63  ;;  %v719_v63 = vrot.slane %v1170_v21, %v1188_v57 }
  0xe9   : > { %v629_v20 = vadd.f32 %v628_v10, %v619_v11  ;;  %v620_v22 = vmul.f32 %v434_v12, %v434_v12  ;;  %v647_v28 = vadd.f32 %v646_v15, %v621_v16  ;;  %v622_v29 = vmul.f32 %v487_v17, %v487_v17 }
  0xea   : > { %v525_v31 = vpop.f32.mrf.mxu0  ;;  %v578_v34 = vpop.f32.mrf.mxu1  ;;  %v524_v47 = vadd.f32 %v523_v18, %v1137_v23  ;;  %v577_v54 = vadd.f32 %v576_v24, %v1137_v23 }
  0xeb   : > { %v630_v32 = vrot.slane %v629_v20, 4  ;;  %v638_v33 = vadd.f32 %v637_v19, %v620_v22  ;;  %v648_v35 = vrot.slane %v647_v28, 4  ;;  %v656_v36 = vadd.f32 %v655_v25, %v622_v29 }
  0xec   : > { %v527_v37 = vpop.f32.mrf.mxu0  ;;  %v580_v40 = vpop.f32.mrf.mxu1  ;;  %v526_v58 = vadd.f32 %v525_v31, %v1137_v23  ;;  %v579_v2 = vadd.f32 %v578_v34, %v1137_v23  ;;  %v599_v5 = vmul.f32 %v524_v47, %v524_v47  ;;  %v601_v11 = vmul.f32 %v577_v54, %v577_v54 }
  0xed   : > { %v639_v39 = vrot.slane %v638_v33, 4  ;;  %v657_v43 = vrot.slane %v656_v36, 4  ;;  %v631_v45 = vadd.f32 %v630_v32, %v629_v20  ;;  %v528_v48 = vadd.f32 %v527_v37, %v1139_v27 }
  0xee   : > { %v529_v44 = vpop.f32.mrf.mxu0  ;;  %v582_v49 = vpop.f32.mrf.mxu1  ;;  %v649_v52 = vadd.f32 %v648_v35, %v647_v28  ;;  %v581_v55 = vadd.f32 %v580_v40, %v1139_v27  ;;  %v600_v14 = vmul.f32 %v526_v58, %v526_v58  ;;  %v602_v20 = vmul.f32 %v579_v2, %v579_v2 }
  0xef   : > { %v640_v46 = vadd.f32 %v639_v39, %v638_v33  ;;  %v658_v53 = vadd.f32 %v657_v43, %v656_v36  ;;  %v530_v59 = vadd.f32 %v529_v44, %v1139_v27  ;;  %v583_v60 = vadd.f32 %v582_v49, %v1139_v27 }
  0xf0   : > { %v533_v56 = vpop.f32.mrf.mxu0  ;;  %v586_v61 = vpop.f32.mrf.mxu1  ;;  %v632_v4 = vrot.slane %v631_v45, 2  ;;  %v607_v7 = vmul.f32 %v528_v48, %v528_v48  ;;  %v650_v10 = vrot.slane %v649_v52, 2  ;;  %v609_v12 = vmul.f32 %v581_v55, %v581_v55 }
  0xf1   : > { %v641_v62 = vrot.slane %v640_v46, 2  ;;  %v659_v1 = vrot.slane %v658_v53, 2  ;;  %v534_v8 = vadd.f32 %v533_v56, %v1141_v30  ;;  %v587_v27 = vadd.f32 %v586_v61, %v1141_v30 }
  0xf2   : > { %v535_v3 = vpop.f32.mrf.mxu0  ;;  %v588_v9 = vpop.f32.mrf.mxu1  ;;  %v608_v15 = vmul.f32 %v530_v59, %v530_v59  ;;  %v610_v16 = vmul.f32 %v583_v60, %v583_v60  ;;  %v633_v24 = vadd.f32 %v632_v4, %v631_v45  ;;  %v663_v25 = vadd.f32 %v607_v7, %v599_v5 }
  0xf3   : > { %v536_v17 = vadd.f32 %v535_v3, %v1141_v30  ;;  %v642_v23 = vadd.f32 %v641_v62, %v640_v46  ;;  %v660_v19 = vadd.f32 %v659_v1, %v658_v53  ;;  %v589_v22 = vadd.f32 %v588_v9, %v1141_v30 }
  0xf4   : > { %v537_v13 = vpop.f32.mrf.mxu0  ;;  %v590_v18 = vpop.f32.mrf.mxu1  ;;  %v615_v28 = vmul.f32 %v534_v8, %v534_v8  ;;  %v617_v29 = vmul.f32 %v587_v27, %v587_v27  ;;  %v651_v33 = vadd.f32 %v650_v10, %v649_v52  ;;  %v681_v34 = vadd.f32 %v609_v12, %v601_v11 }
  0xf5   : > { %v616_v35 = vmul.f32 %v536_v17, %v536_v17  ;;  %v618_v36 = vmul.f32 %v589_v22, %v589_v22  ;;  %v672_v37 = vadd.f32 %v608_v15, %v600_v14  ;;  %v690_v39 = vadd.f32 %v610_v16, %v602_v20 }
  0xf6   : > { %v539_v31 = vpop.f32.mrf.mxu0  ;;  %v592_v32 = vpop.f32.mrf.mxu1  ;;  %v538_v40 = vadd.f32 %v537_v13, %v1154_v50  ;;  %v591_v43 = vadd.f32 %v590_v18, %v1154_v50  ;;  %v643_v44 = vrot.slane %v642_v23, 1  ;;  %v661_v46 = vrot.slane %v660_v19, 1 }
  0xf7   : > { %v540_v30 = vadd.f32 %v539_v31, %v1154_v50  ;;  %v593_v45 = vadd.f32 %v592_v32, %v1154_v50  ;;  %v664_v47 = vadd.f32 %v663_v25, %v615_v28  ;;  %v682_v48 = vadd.f32 %v681_v34, %v617_v29 }
  0xf8   : > { %v623_v49 = vmul.f32 %v538_v40, %v538_v40  ;;  %v625_v53 = vmul.f32 %v591_v43, %v591_v43  ;;  %v673_v52 = vadd.f32 %v672_v37, %v616_v35  ;;  %v691_v54 = vadd.f32 %v690_v39, %v618_v36 }
  0xf9   : > { %v624_v55 = vmul.f32 %v540_v30, %v540_v30  ;;  %v626_v56 = vmul.f32 %v593_v45, %v593_v45  ;;  %v634_v58 = vrot.slane %v633_v24, 1  ;;  %v652_v59 = vrot.slane %v651_v33, 1 }
  0xfa   : > { %v665_v60 = vadd.f32 %v664_v47, %v623_v49  ;;  %v683_v61 = vadd.f32 %v682_v48, %v625_v53  ;;  %v711_v62 = vrot.slane %v1170_v21, %v1181_v42  ;;  %v644_v2 = vadd.f32 %v643_v44, %v642_v23 }
  0xfb   : > { %v674_v1 = vadd.f32 %v673_v52, %v624_v55  ;;  %v692_v50 = vadd.f32 %v691_v54, %v626_v56  ;;  %v662_v3 = vadd.f32 %v661_v46, %v660_v19  ;;  %v715_v7 = vrot.slane %v1170_v21, %v1176_v38 }
  0xfc   : > { %v666_v4 = vrot.slane %v665_v60, 4  ;;  %v684_v5 = vrot.slane %v683_v61, 4  ;;  %v767_v8 = vunpack.c.0.s8 %v1193_v0  ;;  %v635_v11 = vadd.f32 %v634_v58, %v633_v24 }
  0xfd   : > { %v675_v9 = vrot.slane %v674_v1, 4  ;;  %v693_v10 = vrot.slane %v692_v50, 4  ;;  %v653_v12 = vadd.f32 %v652_v59, %v651_v33  ;;  %v701_v14 = vunpack.c.h.bf16 %v1164_v6 }
  0xfe   : > { %v667_v27 = vadd.f32 %v666_v4, %v665_v60  ;;  %v685_v13 = vadd.f32 %v684_v5, %v683_v61  ;;  %v745_v17 = vmul.f32 %v711_v62, %v644_v2  ;;  %v747_v18 = vmul.f32 %v719_v63, %v662_v3 }
  0xff   : > { %v676_v15 = vadd.f32 %v675_v9, %v674_v1  ;;  %v694_v16 = vadd.f32 %v693_v10, %v692_v50  ;;  %v770_v20 = vsub.s32 %v767_v8, %v1156_v51  ;;  %v744_v0 = vmul.f32 %v707_v41, %v635_v11 }
 0x100   : > { %v668_v23 = vrot.slane %v667_v27, 2  ;;  %v686_v19 = vrot.slane %v685_v13, 2  ;;  %v746_v24 = vmul.f32 %v715_v7, %v653_v12  ;;  %v723_v31 = vrot.slane %v701_v14, %v1173_v26 }
 0x101   : > { %v677_v22 = vrot.slane %v676_v15, 2  ;;  %v695_v25 = vrot.slane %v694_v16, 2  ;;  %v731_v6 = vrot.slane %v701_v14, %v1176_v38  ;;  %v761_v34 = vcombine.low %v744_v0, %v745_v17 }
 0x102   : > { %v669_v28 = vadd.f32 %v668_v23, %v667_v27  ;;  %v687_v29 = vadd.f32 %v686_v19, %v685_v13  ;;  %v762_v35 = vcombine.low %v746_v24, %v747_v18  ;;  %v727_v40 = vrot.slane %v701_v14, %v1181_v42 }
 0x103   : > { %v678_v32 = vadd.f32 %v677_v22, %v676_v15  ;;  %v696_v33 = vadd.f32 %v695_v25, %v694_v16  ;;  %v735_v21 = vrot.slane %v701_v14, %v1188_v57  ;;  %v771_v45 = vrot.slane %v761_v34, %v770_v20 }
 0x104   : > { %v670_v36 = vrot.slane %v669_v28, 1  ;;  %v688_v37 = vrot.slane %v687_v29, 1  ;;  %v778_v47 = vrot.slane %v762_v35, %v770_v20  ;;  %v824_v1 = vsub.s32 1, %v1156_v51 }
 0x105   : > { %v679_v39 = vrot.slane %v678_v32, 1  ;;  %v697_v43 = vrot.slane %v696_v33, 1  ;;  %v832_v50 = vsub.s32 3, %v1156_v51  ;;  %v840_v2 = vsub.s32 5, %v1156_v51 }
 0x106   : > { %v671_v41 = vadd.f32 %v670_v36, %v669_v28  ;;  %v689_v44 = vadd.f32 %v688_v37, %v687_v29  ;;  %v793_v56 = vcombine.low %v771_v45, %v778_v47  ;;  %v848_v3 = vsub.s32 7, %v1156_v51 }
 0x107   : > { %v680_v46 = vadd.f32 %v679_v39, %v678_v32  ;;  %v698_v30 = vadd.f32 %v697_v43, %v696_v33 }
 0x108   : > { %v748_v48 = vmul.f32 %v723_v31, %v671_v41  ;;  %v750_v49 = vmul.f32 %v731_v6, %v689_v44  ;;  %v801_v61 = vrot.slane %v793_v56, %v770_v20 }
 0x109   : > { %v749_v53 = vmul.f32 %v727_v40, %v680_v46  ;;  %v751_v52 = vmul.f32 %v735_v21, %v698_v30 }
 0x10b   : > { %v763_v54 = vcombine.low %v748_v48, %v749_v53  ;;  %v764_v55 = vcombine.low %v750_v49, %v751_v52 }
 0x10d   : > { %v785_v58 = vrot.slane %v763_v54, %v770_v20  ;;  %v792_v59 = vrot.slane %v764_v55, %v770_v20 }
 0x10f   : > { %v794_v60 = vcombine.low %v785_v58, %v792_v59 }
 0x111   : > { %v808_v62 = vrot.slane %v794_v60, %v770_v20 }
 0x113   : > { %v809_v63 = vcombine.low %v801_v61, %v808_v62 }
 0x115   : > { %v811_v4 = vmax.f32 %v809_v63, 0.0 }
 0x117   : > { %v821_v5 = vrot.slane %v811_v4, %v1173_v26  ;;  %v825_v7 = vrot.slane %v811_v4, %v824_v1  ;;  %v829_v8 = vrot.slane %v811_v4, %v1181_v42  ;;  %v833_v9 = vrot.slane %v811_v4, %v832_v50 }
 0x118   : > { %v837_v10 = vrot.slane %v811_v4, %v1176_v38  ;;  %v841_v11 = vrot.slane %v811_v4, %v840_v2  ;;  %v845_v12 = vrot.slane %v811_v4, %v1188_v57  ;;  %v849_v27 = vrot.slane %v811_v4, %v848_v3 }
 0x119   : > { %v859_v13 = vsel %vm858_vm1, %v821_v5, -inf  ;;  %v860_v14 = vsel %vm858_vm1, %v825_v7, -inf  ;;  %v861_v51 = vsel %vm858_vm1, %v829_v8, -inf  ;;  %v862_v15 = vsel %vm858_vm1, %v833_v9, -inf }
 0x11a   : > { %v863_v26 = vsel %vm858_vm1, %v837_v10, -inf  ;;  %v865_v16 = vsel %vm858_vm1, %v841_v11, -inf  ;;  %v867_v42 = vsel %vm858_vm1, %v845_v12, -inf  ;;  %v869_v38 = vsel %vm858_vm1, %v849_v27, -inf }
 0x11b   : > { %v864_v17 = vmax.f32 %v859_v13, %v863_v26  ;;  %v866_v57 = vmax.f32 %v860_v14, %v865_v16  ;;  %v868_v18 = vmax.f32 %v861_v51, %v867_v42  ;;  %v870_v23 = vmax.f32 %v862_v15, %v869_v38 }
 0x11d   : > { %v871_v19 = vmax.f32 %v864_v17, %v866_v57  ;;  %v872_v20 = vmax.f32 %v868_v18, %v870_v23 }
 0x11f   : > { %v873_v22 = vmax.f32 %v871_v19, %v872_v20 }
 0x121   : > { %874 = vmax.xlane.f32.xlu0 %v873_v22 }
 0x1aa   : > { %v875_v25 = vpop.xlane.xlu0 %874 }
 0x1ab   : > { %v876_v0 = vrot.slane %v875_v25, 4 }
 0x1ad   : > { %v877_v24 = vmax.f32 %v875_v25, %v876_v0 }
 0x1af   : > { %v878_v28 = vrot.slane %v877_v24, 2 }
 0x1b1   : > { %v879_v29 = vmax.f32 %v877_v24, %v878_v28 }
 0x1b3   : > { %v880_v31 = vrot.slane %v879_v29, 1 }
 0x1b5   : > { %v881_v6 = vmax.f32 %v879_v29, %v880_v31 }
 0x1b7   : > { %1004 = vpush %v881_v6 }
 0x1e8   : > { %s1005_s20 = spop %1004 }
 0x1e9   : > { %v883_v32 = vstv %s1005_s20 }
 0x1ea   : > { %885 = vst [vmem:[%s283_s19] sm:$0x1] %v883_v32 }
 0x1eb PF: > { %s14_s17 = sadd.s32 1, %s1058_s17   ;;  %s1254_s15 = smov %s1054_s16 }
 0x1ec   : > { %p11_p5 = scmp.ge.s32.totalorder %s14_s17, 4   ;;  %s1255_s16 = smov %s1257_s18 }
 0x1ee   :  { %13 = sbr.rel (!%p11_p5) target bundleno = 2 (0x2), region = 77 }

// kernel: segmenter_forward.3
= control target key start
LH: loop header
LB: loop body
LE: loop exit
PB: predicated region body
PF: predicated region fallthrough
CT: control target
= control target key end

     0   :  { %s2438_s0 = inlined_call_operand.vmem [shape: f32[2], index: 0, kind: input, shape index: {}]   ;;  %s2439_s1 = inlined_call_operand.vmem [shape: bf16[2,16,1024], index: 1, kind: input, shape index: {}]   ;;  %s2440_s2 = inlined_call_operand.vmem [shape: bf16[32,16], index: 2, kind: input, shape index: {}]   ;;  %s2441_s3 = inlined_call_operand.vmem [shape: f32[32,1], index: 3, kind: input, shape index: {}]   ;;  %s2442_s4 = inlined_call_operand.vmem [shape: bf16[32,32], index: 4, kind: input, shape index: {}]   ;;  %s2443_s5 = inlined_call_operand.vmem [shape: f32[32,1], index: 5, kind: input, shape index: {}]   ;;  %s2444_s6 = inlined_call_operand.vmem [shape: bf16[2,32,1024], index: 6, kind: output, shape index: {0}]   ;;  %s2445_s7 = inlined_call_operand.vmem [shape: bf16[2,32,1024], index: 7, kind: output, shape index: {1}]  }
   0x1   :  { %s13_s26 = sshll.u32 %s2438_s0, 4  ;;  %s14_s26 = int_to_ptr.vmem [resolvable:$true] %s13_s26 }
   0x2   :  { %s1780_s27 = scalar_lea.vmem %s14_s26, 16  ;;  %p1785_p1 = scmp.lt.s32.totalorder %s14_s26, %s14_s26 }
   0x3   :  { %p1781_p0 = scmp.ne.s32.totalorder %s14_s26, %s1780_s27  ;;  %p1786_p2 = scmp.lt.s32.totalorder %s1780_s27, %s1780_s27 }
   0x5   :  { %p1787_p3 = por %p1786_p2, %p1785_p1 }
   0x7   :  { %p1788_p4 = pnand %p1787_p3, %p1781_p0 }
   0x9   :  { %1791 = shalt.err (!%p1788_p4)  }
   0xa   :  { %s1818_s28 = smov [#allocation3]  }
   0xb   :  { %16 = dma.vmem_to_smem %s14_s26, 16, %s1818_s28, [#allocation2] }
   0xc   :  { %1804 = dma.done.wait [#allocation2], 16 }
   0xd   :  { %1805 = vsyncadd [#allocation2], 4294967280 }
   0xe   :  { %18 = sfence }
   0xf   :  { %s1863_s29 = smov 0   ;;  %s1865_s30 = smov 0  }
  0x10   :  { %s1867_s8 = smov 0  }
  0x11 LB: > { %s36_s0 = sadd.s32 1, %s1812_s30  ;;  %p1564_p5 = scmp.ge.s32.totalorder %s1816_s8, 1  ;;  %s1816_s8 = sphi %s1867_s8, %s24_s8   ;;  %s1812_s30 = sphi %s1865_s30, %s2447_s30   ;;  %s1808_s29 = sphi %s1863_s29, %s2446_s29  }
  0x12   : > { %p38_p6 = scmp.ge.s32.totalorder %s36_s0, 2  ;;  %p245_p7 = scmp.lt.s32.totalorder %s1816_s8, 3 }
  0x14   : > { %s2449_s0 = smov (%p38_p6, %s36_s0), 0  ;;  %p246_p8 = pnand %p1564_p5, %p245_p7 }
  0x15   : > { %p293_p9 = scmp.lt.s32.totalorder (!%p246_p8), %s1808_s29, 1  ;;  %s323_s15 = sld [smem:[#allocation3 + %s1808_s29]] (!%p246_p8) }
  0x16   : > { %249 = sbr.rel (%p246_p8) target bundleno = 583 (0x247), region = 40 }
  0x1b   : > { %v1819_v0 = vmov 0   ;;  %s1887_s9 = scalar_select %p293_p9, %s1808_s29, 1  ;;  %v338_v1 = vld [vmem:[%s2441_s3 + $0x10] sm:$0xff]  ;;  %v336_v2 = vld [vmem:[%s2441_s3] sm:$0xff]  ;;  %v339_v3 = vld [vmem:[%s2441_s3 + $0x18] sm:$0xff]  ;;  %vm410_vm0 = vcmask 130048   ;;  %v1945_v31 = vstv %s323_s15 }
  0x1c   : > { %449 = vmatprep.mubr.bf16.mxu0 %v1819_v0  ;;  %502 = vmatprep.mubr.bf16.mxu1 %v1819_v0  ;;  %v337_v4 = vld [vmem:[%s2441_s3 + $0x8] sm:$0xff]  ;;  %v1696_v18 = vld [vmem:[%s2440_s2] sm:$0xff]   ;;  %v684_v24 = vld [vmem:[%s2443_s5 + $0x10] sm:$0xff]  ;;  %vm716_vm1 = vcmask 261120  }
  0x1d   : > { %1694 = vset.pattern.permute.xlu0 %v1819_v0  ;;  %1695 = vset.pattern.permute.xlu1 %v1819_v0  ;;  %s1633_s14 = sshll.u32 %s1887_s9, 6  ;;  %v682_v20 = vld [vmem:[%s2443_s5] sm:$0xff]  ;;  %v683_v21 = vld [vmem:[%s2443_s5 + $0x8] sm:$0xff]  ;;  %v685_v25 = vld [vmem:[%s2443_s5 + $0x18] sm:$0xff]  ;;  %s1634_s16 = sshll.u32 %s1887_s9, 7 }
  0x1e   : > { %352 = vperm.xlu0 %1694, %v338_v1   ;;  %342 = vperm.xlu1 %1695, %v336_v2   ;;  %s300_s21 = scalar_lea.vmem %s2439_s1, %s1633_s14  ;;  %v1697_v26 = vld [vmem:[%s2440_s2 + $0x8] sm:$0xff]   ;;  %s1965_s18 = scalar_lea.vmem %s2445_s7, %s1634_s16 }
  0x1f   : > { %v324_v5 = vld [vmem:[%s300_s21] sm:$0xff]  ;;  %v325_v7 = vld [vmem:[%s300_s21 + $0x8] sm:$0xff]  ;;  %v326_v11 = vld [vmem:[%s300_s21 + $0x10] sm:$0xff]  ;;  %s2382_s25 = scalar_lea.vmem %s2444_s6, %s1634_s16 }
  0x20   : > { %v328_v6 = vld [vmem:[%s300_s21 + $0x20] sm:$0xff]  ;;  %v329_v9 = vld [vmem:[%s300_s21 + $0x28] sm:$0xff]  ;;  %v330_v12 = vld [vmem:[%s300_s21 + $0x30] sm:$0xff] }
  0x21   : > { %v1574_v8 = vcombine.high %v324_v5, %v328_v6  ;;  %v1573_v10 = vcombine.low %v324_v5, %v328_v6  ;;  %v1576_v13 = vcombine.high %v325_v7, %v329_v9  ;;  %v1575_v14 = vcombine.low %v325_v7, %v329_v9  ;;  %v327_v16 = vld [vmem:[%s300_s21 + $0x18] sm:$0xff] }
  0x22   : > { %357 = vperm.xlu0 %1694, %v339_v3   ;;  %347 = vperm.xlu1 %1695, %v337_v4   ;;  %v1578_v15 = vcombine.high %v326_v11, %v330_v12  ;;  %v331_v17 = vld [vmem:[%s300_s21 + $0x38] sm:$0xff]  ;;  %v1577_v22 = vcombine.low %v326_v11, %v330_v12 }
  0x23   : > { %431 = vmatprep.subr.bf16.mxu0 %v1574_v8  ;;  %v1580_v19 = vcombine.high %v327_v16, %v331_v17  ;;  %484 = vmatprep.subr.bf16.mxu1 %v1576_v13  ;;  %v1579_v23 = vcombine.low %v327_v16, %v331_v17 }
  0x24   : > { %432 = vmatpush1.bf16.msra.mxu0 %v1573_v10  ;;  %485 = vmatpush1.bf16.msra.mxu1 %v1575_v14 }
  0x25   : > { %537 = vmatprep.subr.bf16.mxu0 %v1578_v15  ;;  %590 = vmatprep.subr.bf16.mxu1 %v1580_v19 }
  0x26   : > { %688 = vperm.xlu0 %1694, %v682_v20   ;;  %693 = vperm.xlu1 %1695, %v683_v21  }
  0x27   : > { %1581 = vmatmul.mubr.msk.bf16.vlgmr.msra.gmra.mxu0 %vm410_vm0, %v1696_v18  ;;  %1583 = vmatmul.mubr.msk.bf16.vlgmr.msra.gmra.mxu1 %vm410_vm0, %v1696_v18 }
  0x28   : > { %459 = vmatprep.mubr.bf16.mxu0 %v1819_v0  ;;  %512 = vmatprep.mubr.bf16.mxu1 %v1819_v0 }
  0x29   : > { %538 = vmatpush1.bf16.msra.mxu0 %v1577_v22  ;;  %591 = vmatpush1.bf16.msra.mxu1 %v1579_v23 }
  0x2a   : > { %698 = vperm.xlu0 %1694, %v684_v24   ;;  %703 = vperm.xlu1 %1695, %v685_v25  }
  0x2f   : > { %1582 = vmatmul.mubr.msk.bf16.gmra.mxu0 %vm410_vm0, %v1697_v26  ;;  %1584 = vmatmul.mubr.msk.bf16.gmra.mxu1 %vm410_vm0, %v1697_v26 }
  0x30   : > { %555 = vmatprep.mubr.bf16.mxu0 %v1819_v0  ;;  %608 = vmatprep.mubr.bf16.mxu1 %v1819_v0 }
  0x37   : > { %1585 = vmatmul.mubr.msk.bf16.vlgmr.msra.gmra.mxu0 %vm410_vm0, %v1696_v18  ;;  %1587 = vmatmul.mubr.msk.bf16.vlgmr.msra.gmra.mxu1 %vm410_vm0, %v1696_v18 }
  0x38   : > { %565 = vmatprep.mubr.bf16.mxu0 %v1819_v0  ;;  %618 = vmatprep.mubr.bf16.mxu1 %v1819_v0 }
  0x3f   : > { %1586 = vmatmul.mubr.msk.bf16.gmra.mxu0 %vm410_vm0, %v1697_v26  ;;  %1588 = vmatmul.mubr.msk.bf16.gmra.mxu1 %vm410_vm0, %v1697_v26 }
  0x40   : > { %755 = vmatprep.mubr.bf16.mxu0 %v1819_v0  ;;  %808 = vmatprep.mubr.bf16.mxu1 %v1819_v0 }
  0x99   : > { %v1942_v27 = vpop.permute.xlu1 %342  ;;  %v1967_v43 = vpop.permute.xlu0 %352 }
  0x9d   : > { %v1948_v34 = vpop.permute.xlu1 %347  ;;  %v2001_v2 = vpop.permute.xlu0 %357 }
  0xe7   : > { %v451_v28 = vpop.f32.mrf.mxu0  ;;  %v504_v30 = vpop.f32.mrf.mxu1 }
  0xe8   : > { %v452_v29 = vadd.f32 %v451_v28, %v1942_v27  ;;  %v505_v32 = vadd.f32 %v504_v30, %v1942_v27 }
  0xe9   : > { %v453_v33 = vpop.f32.mrf.mxu0  ;;  %v506_v36 = vpop.f32.mrf.mxu1 }
  0xea   : > { %v454_v35 = vadd.f32 %v453_v33, %v1942_v27  ;;  %v507_v37 = vadd.f32 %v506_v36, %v1942_v27  ;;  %v1954_v39 = vmul.f32 %v1945_v31, %v452_v29  ;;  %v1970_v44 = vmul.f32 %v1945_v31, %v505_v32 }
  0xeb   : > { %v455_v38 = vpop.f32.mrf.mxu0  ;;  %v508_v42 = vpop.f32.mrf.mxu1 }
  0xec   : > { %v1957_v40 = vmul.f32 %v1945_v31, %v454_v35  ;;  %v456_v41 = vadd.f32 %v455_v38, %v1948_v34  ;;  %v1973_v45 = vmul.f32 %v1945_v31, %v507_v37  ;;  %v509_v46 = vadd.f32 %v508_v42, %v1948_v34 }
  0xed   : > { %v457_v47 = vpop.f32.mrf.mxu0  ;;  %v510_v50 = vpop.f32.mrf.mxu1 }
  0xee   : > { %v1652_v48 = vpack.c.bf16 %v1957_v40, %v1954_v39  ;;  %v458_v49 = vadd.f32 %v457_v47, %v1948_v34  ;;  %v1653_v51 = vpack.c.bf16 %v1973_v45, %v1970_v44  ;;  %v511_v52 = vadd.f32 %v510_v50, %v1948_v34 }
  0xef   : > { %v461_v53 = vpop.f32.mrf.mxu0  ;;  %v1984_v54 = vmul.f32 %v1945_v31, %v456_v41  ;;  %v514_v57 = vpop.f32.mrf.mxu1  ;;  %v1992_v58 = vmul.f32 %v1945_v31, %v509_v46 }
  0xf0   : > { %1407 = vst [vmem:[%s1965_s18] sm:$0xff] %v1652_v48  ;;  %v1987_v55 = vmul.f32 %v1945_v31, %v458_v49  ;;  %v462_v56 = vadd.f32 %v461_v53, %v1967_v43  ;;  %1408 = vst [vmem:[%s1965_s18 + $0x8] sm:$0xff] %v1653_v51  ;;  %v1995_v59 = vmul.f32 %v1945_v31, %v511_v52 }
  0xf1   : > { %v515_v60 = vadd.f32 %v514_v57, %v1967_v43  ;;  %v463_v61 = vpop.f32.mrf.mxu0  ;;  %v516_v1 = vpop.f32.mrf.mxu1  ;;  %v666_v57 = vpack.c.bf16 %v1984_v54, %v1954_v39  ;;  %v2065_v39 = vld [vmem:[%s2442_s4] sm:$0xff]  }
  0xf2   : > { %v1656_v62 = vpack.c.bf16 %v1987_v55, %v1984_v54  ;;  %v464_v63 = vadd.f32 %v463_v61, %v1967_v43  ;;  %v1657_v3 = vpack.c.bf16 %v1995_v59, %v1992_v58  ;;  %v517_v4 = vadd.f32 %v516_v1, %v1967_v43 }
  0xf3   : > { %v465_v5 = vpop.f32.mrf.mxu0  ;;  %v646_v6 = vmul.f32 %v1945_v31, %v462_v56  ;;  %v518_v9 = vpop.f32.mrf.mxu1  ;;  %v648_v10 = vmul.f32 %v1945_v31, %v515_v60  ;;  %v667_v29 = vpack.c.bf16 %v1987_v55, %v1957_v40  ;;  %v669_v36 = vpack.c.bf16 %v1995_v59, %v1973_v45 }
  0xf4   : > { %1411 = vst [vmem:[%s1965_s18 + $0x20] sm:$0xff] %v1656_v62  ;;  %v647_v7 = vmul.f32 %v1945_v31, %v464_v63  ;;  %v466_v8 = vadd.f32 %v465_v5, %v2001_v2  ;;  %1412 = vst [vmem:[%s1965_s18 + $0x28] sm:$0xff] %v1657_v3  ;;  %v649_v11 = vmul.f32 %v1945_v31, %v517_v4 }
  0xf5   : > { %v519_v12 = vadd.f32 %v518_v9, %v2001_v2  ;;  %v467_v13 = vpop.f32.mrf.mxu0  ;;  %v520_v16 = vpop.f32.mrf.mxu1  ;;  %v668_v62 = vpack.c.bf16 %v1992_v58, %v1970_v44 }
  0xf6   : > { %v1660_v14 = vpack.c.bf16 %v647_v7, %v646_v6  ;;  %v468_v15 = vadd.f32 %v467_v13, %v2001_v2  ;;  %v1661_v17 = vpack.c.bf16 %v649_v11, %v648_v10  ;;  %v654_v18 = vmul.f32 %v1945_v31, %v466_v8 }
  0xf7   : > { %v521_v19 = vadd.f32 %v520_v16, %v2001_v2  ;;  %v557_v20 = vpop.f32.mrf.mxu0  ;;  %v656_v21 = vmul.f32 %v1945_v31, %v519_v12  ;;  %v610_v24 = vpop.f32.mrf.mxu1 }
  0xf8   : > { %1415 = vst [vmem:[%s1965_s18 + $0x40] sm:$0xff] %v1660_v14  ;;  %v655_v22 = vmul.f32 %v1945_v31, %v468_v15  ;;  %v558_v23 = vadd.f32 %v557_v20, %v1942_v27  ;;  %1416 = vst [vmem:[%s1965_s18 + $0x48] sm:$0xff] %v1661_v17  ;;  %v611_v26 = vadd.f32 %v610_v24, %v1942_v27 }
  0xf9   : > { %v657_v25 = vmul.f32 %v1945_v31, %v521_v19  ;;  %v559_v28 = vpop.f32.mrf.mxu0  ;;  %v612_v33 = vpop.f32.mrf.mxu1  ;;  %v674_v37 = vpack.c.bf16 %v654_v18, %v646_v6  ;;  %v676_v47 = vpack.c.bf16 %v656_v21, %v648_v10 }
  0xfa   : > { %v1664_v30 = vpack.c.bf16 %v655_v22, %v654_v18  ;;  %v560_v32 = vadd.f32 %v559_v28, %v1942_v27  ;;  %v675_v35 = vpack.c.bf16 %v655_v22, %v647_v7  ;;  %v613_v41 = vadd.f32 %v612_v33, %v1942_v27 }
  0xfb   : > { %v1665_v38 = vpack.c.bf16 %v657_v25, %v656_v21  ;;  %v561_v42 = vpop.f32.mrf.mxu0  ;;  %v677_v46 = vpack.c.bf16 %v657_v25, %v649_v11  ;;  %v2032_v48 = vmul.f32 %v1945_v31, %v558_v23  ;;  %v614_v50 = vpop.f32.mrf.mxu1  ;;  %v2040_v45 = vmul.f32 %v1945_v31, %v611_v26  ;;  %v1699_v26 = vld [vmem:[%s2442_s4 + $0x8] sm:$0xff]  }
  0xfc   : > { %1419 = vst [vmem:[%s1965_s18 + $0x60] sm:$0xff] %v1664_v30  ;;  %v2035_v40 = vmul.f32 %v1945_v31, %v560_v32  ;;  %v562_v49 = vadd.f32 %v561_v42, %v1948_v34  ;;  %735 = vmatprep.subr.bf16.mxu0 %v675_v35  ;;  %v2043_v27 = vmul.f32 %v1945_v31, %v613_v41 }
  0xfd   : > { %1420 = vst [vmem:[%s1965_s18 + $0x68] sm:$0xff] %v1665_v38  ;;  %v615_v51 = vadd.f32 %v614_v50, %v1948_v34  ;;  %788 = vmatprep.subr.bf16.mxu1 %v677_v46  ;;  %v563_v52 = vpop.f32.mrf.mxu0  ;;  %736 = vmatpush1.bf16.msra.mxu0 %v674_v37  ;;  %v616_v56 = vpop.f32.mrf.mxu1 }
  0xfe   : > { %v1654_v53 = vpack.c.bf16 %v2035_v40, %v2032_v48  ;;  %v564_v55 = vadd.f32 %v563_v52, %v1948_v34  ;;  %789 = vmatpush1.bf16.msra.mxu1 %v676_v47  ;;  %737 = vmatprep.subr.bf16.mxu0 %v667_v29  ;;  %v1655_v59 = vpack.c.bf16 %v2043_v27, %v2040_v45  ;;  %v2118_v46 = vpop.permute.xlu0 %688  ;;  %v2120_v50 = vpop.permute.xlu1 %693 }
  0xff   : > { %v617_v60 = vadd.f32 %v616_v56, %v1948_v34  ;;  %790 = vmatprep.subr.bf16.mxu1 %v669_v36  ;;  %v567_v61 = vpop.f32.mrf.mxu0  ;;  %v2058_v63 = vmul.f32 %v1945_v31, %v562_v49  ;;  %v620_v4 = vpop.f32.mrf.mxu1  ;;  %v644_v34 = vmul.f32 %v1945_v31, %v615_v51 }
 0x100   : > { %1409 = vst [vmem:[%s1965_s18 + $0x10] sm:$0xff] %v1654_v53  ;;  %v643_v1 = vmul.f32 %v1945_v31, %v564_v55  ;;  %v568_v3 = vadd.f32 %v567_v61, %v1967_v43  ;;  %1410 = vst [vmem:[%s1965_s18 + $0x18] sm:$0xff] %v1655_v59  ;;  %v621_v54 = vadd.f32 %v620_v4, %v1967_v43 }
 0x101   : > { %v645_v44 = vmul.f32 %v1945_v31, %v617_v60  ;;  %v569_v58 = vpop.f32.mrf.mxu0  ;;  %738 = vmatpush1.bf16.msra.mxu0 %v666_v57  ;;  %v622_v7 = vpop.f32.mrf.mxu1  ;;  %v672_v38 = vpack.c.bf16 %v644_v34, %v2040_v45 }
 0x102   : > { %v1658_v5 = vpack.c.bf16 %v643_v1, %v2058_v63  ;;  %v570_v6 = vadd.f32 %v569_v58, %v1967_v43  ;;  %791 = vmatpush1.bf16.msra.mxu1 %v668_v62  ;;  %v623_v9 = vadd.f32 %v622_v7, %v1967_v43  ;;  %v650_v11 = vmul.f32 %v1945_v31, %v568_v3 }
 0x103   : > { %v1659_v8 = vpack.c.bf16 %v645_v44, %v644_v34  ;;  %v571_v10 = vpop.f32.mrf.mxu0  ;;  %v624_v14 = vpop.f32.mrf.mxu1  ;;  %v652_v15 = vmul.f32 %v1945_v31, %v621_v54  ;;  %v671_v36 = vpack.c.bf16 %v643_v1, %v2035_v40  ;;  %v673_v37 = vpack.c.bf16 %v645_v44, %v2043_v27 }
 0x104   : > { %1413 = vst [vmem:[%s1965_s18 + $0x30] sm:$0xff] %v1658_v5  ;;  %v651_v12 = vmul.f32 %v1945_v31, %v570_v6  ;;  %v572_v13 = vadd.f32 %v571_v10, %v2001_v2  ;;  %1591 = vmatmul.mubr.msk.bf16.vlgmr.msra.gmra.mxu0 %vm716_vm1, %v2065_v39  ;;  %v653_v16 = vmul.f32 %v1945_v31, %v623_v9  ;;  %v2156_v34 = vpop.permute.xlu1 %703 }
 0x105   : > { %1414 = vst [vmem:[%s1965_s18 + $0x38] sm:$0xff] %v1659_v8  ;;  %v625_v43 = vadd.f32 %v624_v14, %v2001_v2  ;;  %1593 = vmatmul.mubr.msk.bf16.vlgmr.msra.gmra.mxu1 %vm716_vm1, %v2065_v39  ;;  %v573_v17 = vpop.f32.mrf.mxu0  ;;  %765 = vmatprep.mubr.bf16.mxu0 %v1819_v0  ;;  %v626_v20 = vpop.f32.mrf.mxu1 }
 0x106   : > { %v1662_v18 = vpack.c.bf16 %v651_v12, %v650_v11  ;;  %v574_v19 = vadd.f32 %v573_v17, %v2001_v2  ;;  %818 = vmatprep.mubr.bf16.mxu1 %v1819_v0  ;;  %v1663_v21 = vpack.c.bf16 %v653_v16, %v652_v15  ;;  %v627_v22 = vadd.f32 %v626_v20, %v2001_v2 }
 0x107   : > { %v658_v23 = vmul.f32 %v1945_v31, %v572_v13  ;;  %v660_v24 = vmul.f32 %v1945_v31, %v625_v43 }
 0x108   : > { %1417 = vst [vmem:[%s1965_s18 + $0x50] sm:$0xff] %v1662_v18  ;;  %v659_v25 = vmul.f32 %v1945_v31, %v574_v19  ;;  %1418 = vst [vmem:[%s1965_s18 + $0x58] sm:$0xff] %v1663_v21  ;;  %v661_v28 = vmul.f32 %v1945_v31, %v627_v22  ;;  %v670_v31 = vpack.c.bf16 %v2058_v63, %v2032_v48 }
 0x109   : > { %v678_v2 = vpack.c.bf16 %v658_v23, %v650_v11  ;;  %v680_v35 = vpack.c.bf16 %v660_v24, %v652_v15 }
 0x10a   : > { %v1666_v29 = vpack.c.bf16 %v659_v25, %v658_v23  ;;  %v679_v30 = vpack.c.bf16 %v659_v25, %v651_v12  ;;  %v1667_v32 = vpack.c.bf16 %v661_v28, %v660_v24  ;;  %v681_v33 = vpack.c.bf16 %v661_v28, %v653_v16 }
 0x10c   : > { %1421 = vst [vmem:[%s1965_s18 + $0x70] sm:$0xff] %v1666_v29  ;;  %1592 = vmatmul.mubr.msk.bf16.gmra.mxu0 %vm716_vm1, %v1699_v26  ;;  %841 = vmatprep.subr.bf16.mxu0 %v679_v30  ;;  %1422 = vst [vmem:[%s1965_s18 + $0x78] sm:$0xff] %v1667_v32 }
 0x10d   : > { %1594 = vmatmul.mubr.msk.bf16.gmra.mxu1 %vm716_vm1, %v1699_v26  ;;  %894 = vmatprep.subr.bf16.mxu1 %v681_v33 }
 0x10e   : > { %842 = vmatpush1.bf16.msra.mxu0 %v678_v2  ;;  %895 = vmatpush1.bf16.msra.mxu1 %v680_v35 }
 0x10f   : > { %843 = vmatprep.subr.bf16.mxu0 %v671_v36  ;;  %896 = vmatprep.subr.bf16.mxu1 %v673_v37 }
 0x110   : > { %861 = vmatprep.mubr.bf16.mxu0 %v1819_v0  ;;  %914 = vmatprep.mubr.bf16.mxu1 %v1819_v0 }
 0x112   : > { %844 = vmatpush1.bf16.msra.mxu0 %v670_v31  ;;  %897 = vmatpush1.bf16.msra.mxu1 %v672_v38 }
 0x115   : > { %1595 = vmatmul.mubr.msk.bf16.vlgmr.msra.gmra.mxu0 %vm716_vm1, %v2065_v39  ;;  %1597 = vmatmul.mubr.msk.bf16.vlgmr.msra.gmra.mxu1 %vm716_vm1, %v2065_v39 }
 0x116   : > { %871 = vmatprep.mubr.bf16.mxu0 %v1819_v0  ;;  %924 = vmatprep.mubr.bf16.mxu1 %v1819_v0  ;;  %v2125_v0 = vpop.permute.xlu0 %698 }
 0x11d   : > { %1596 = vmatmul.mubr.msk.bf16.gmra.mxu0 %vm716_vm1, %v1699_v26  ;;  %1598 = vmatmul.mubr.msk.bf16.gmra.mxu1 %vm716_vm1, %v1699_v26 }
 0x1c4   : > { %v757_v41 = vpop.f32.mrf.mxu0 }
 0x1c5   : > { %v810_v42 = vpop.f32.mrf.mxu1  ;;  %v2131_v55 = vadd.f32 %v757_v41, %v2118_v46 }
 0x1c6   : > { %v759_v47 = vpop.f32.mrf.mxu0  ;;  %v2140_v60 = vadd.f32 %v810_v42, %v2118_v46 }
 0x1c7   : > { %v812_v48 = vpop.f32.mrf.mxu1  ;;  %v2149_v1 = vadd.f32 %v759_v47, %v2118_v46 }
 0x1c8   : > { %v761_v40 = vpop.f32.mrf.mxu0  ;;  %v2159_v44 = vadd.f32 %v812_v48, %v2118_v46 }
 0x1c9   : > { %v814_v49 = vpop.f32.mrf.mxu1  ;;  %v2123_v27 = vadd.f32 %v761_v40, %v2120_v50 }
 0x1ca   : > { %v763_v45 = vpop.f32.mrf.mxu0  ;;  %v2128_v52 = vadd.f32 %v814_v49, %v2120_v50 }
 0x1cb   : > { %v816_v51 = vpop.f32.mrf.mxu1  ;;  %v2134_v56 = vadd.f32 %v763_v45, %v2120_v50  ;;  %v935_v3 = vmax.f32 %v2131_v55, %v2123_v27 }
 0x1cc   : > { %v767_v53 = vpop.f32.mrf.mxu0  ;;  %v2143_v61 = vadd.f32 %v816_v51, %v2120_v50  ;;  %v953_v54 = vmax.f32 %v2140_v60, %v2128_v52 }
 0x1cd   : > { %v2137_v57 = vadd.f32 %v767_v53, %v2125_v0  ;;  %v820_v59 = vpop.f32.mrf.mxu1  ;;  %v944_v6 = vmax.f32 %v2149_v1, %v2134_v56 }
 0x1ce   : > { %v2146_v62 = vadd.f32 %v820_v59, %v2125_v0  ;;  %v769_v63 = vpop.f32.mrf.mxu0  ;;  %v962_v10 = vmax.f32 %v2159_v44, %v2143_v61 }
 0x1cf   : > { %v2154_v4 = vadd.f32 %v769_v63, %v2125_v0  ;;  %v822_v39 = vpop.f32.mrf.mxu1  ;;  %v936_v7 = vmax.f32 %v935_v3, %v2137_v57 }
 0x1d0   : > { %v2164_v58 = vadd.f32 %v822_v39, %v2125_v0  ;;  %v771_v5 = vpop.f32.mrf.mxu0  ;;  %v954_v11 = vmax.f32 %v953_v54, %v2146_v62 }
 0x1d1   : > { %v2170_v8 = vadd.f32 %v771_v5, %v2156_v34  ;;  %v824_v9 = vpop.f32.mrf.mxu1  ;;  %v945_v14 = vmax.f32 %v944_v6, %v2154_v4 }
 0x1d2   : > { %v2176_v12 = vadd.f32 %v824_v9, %v2156_v34  ;;  %v773_v13 = vpop.f32.mrf.mxu0  ;;  %v963_v17 = vmax.f32 %v962_v10, %v2164_v58 }
 0x1d3   : > { %v937_v15 = vmax.f32 %v936_v7, %v2170_v8  ;;  %v2181_v16 = vadd.f32 %v773_v13, %v2156_v34  ;;  %v826_v43 = vpop.f32.mrf.mxu1 }
 0x1d4   : > { %v955_v18 = vmax.f32 %v954_v11, %v2176_v12  ;;  %v2186_v19 = vadd.f32 %v826_v43, %v2156_v34 }
 0x1d5   : > { %v938_v20 = vrot.slane %v937_v15, 4  ;;  %v946_v21 = vmax.f32 %v945_v14, %v2181_v16  ;;  %v863_v22 = vpop.f32.mrf.mxu0  ;;  %v916_v23 = vpop.f32.mrf.mxu1 }
 0x1d6   : > { %v956_v24 = vrot.slane %v955_v18, 4  ;;  %v964_v25 = vmax.f32 %v963_v17, %v2186_v19  ;;  %v2197_v53 = vadd.f32 %v863_v22, %v2118_v46  ;;  %v2200_v59 = vadd.f32 %v916_v23, %v2118_v46 }
 0x1d7   : > { %v939_v26 = vmax.f32 %v937_v15, %v938_v20  ;;  %v947_v28 = vrot.slane %v946_v21, 4  ;;  %v865_v29 = vpop.f32.mrf.mxu0  ;;  %v918_v30 = vpop.f32.mrf.mxu1 }
 0x1d8   : > { %v957_v32 = vmax.f32 %v955_v18, %v956_v24  ;;  %v965_v33 = vrot.slane %v964_v25, 4  ;;  %v2203_v39 = vadd.f32 %v865_v29, %v2118_v46  ;;  %v2206_v54 = vadd.f32 %v918_v30, %v2118_v46 }
 0x1d9   : > { %v940_v2 = vrot.slane %v939_v26, 2  ;;  %v948_v35 = vmax.f32 %v946_v21, %v947_v28  ;;  %v867_v36 = vpop.f32.mrf.mxu0  ;;  %v920_v37 = vpop.f32.mrf.mxu1 }
 0x1da   : > { %v958_v31 = vrot.slane %v957_v32, 2  ;;  %v966_v38 = vmax.f32 %v964_v25, %v965_v33  ;;  %v2191_v41 = vadd.f32 %v867_v36, %v2120_v50  ;;  %v2194_v48 = vadd.f32 %v920_v37, %v2120_v50 }
 0x1db   : > { %v941_v42 = vmax.f32 %v939_v26, %v940_v2  ;;  %v949_v47 = vrot.slane %v948_v35, 2  ;;  %v869_v40 = vpop.f32.mrf.mxu0  ;;  %v922_v49 = vpop.f32.mrf.mxu1 }
 0x1dc   : > { %v959_v45 = vmax.f32 %v957_v32, %v958_v31  ;;  %v967_v51 = vrot.slane %v966_v38, 2  ;;  %v971_v10 = vmax.f32 %v2197_v53, %v2191_v41  ;;  %v2211_v11 = vadd.f32 %v869_v40, %v2120_v50 }
 0x1dd   : > { %v942_v63 = vrot.slane %v941_v42, 1  ;;  %v950_v3 = vmax.f32 %v948_v35, %v949_v47  ;;  %v873_v5 = vpop.f32.mrf.mxu0  ;;  %v926_v6 = vpop.f32.mrf.mxu1  ;;  %v989_v15 = vmax.f32 %v2200_v59, %v2194_v48  ;;  %v2216_v43 = vadd.f32 %v922_v49, %v2120_v50 }
 0x1de   : > { %v960_v7 = vrot.slane %v959_v45, 1  ;;  %v968_v9 = vmax.f32 %v966_v38, %v967_v51  ;;  %v2219_v18 = vadd.f32 %v873_v5, %v2125_v0  ;;  %v2222_v20 = vadd.f32 %v926_v6, %v2125_v0 }
 0x1df   : > { %v943_v13 = vmax.f32 %v941_v42, %v942_v63  ;;  %v951_v14 = vrot.slane %v950_v3, 1  ;;  %v980_v28 = vmax.f32 %v2203_v39, %v2211_v11  ;;  %v875_v29 = vpop.f32.mrf.mxu0  ;;  %v928_v30 = vpop.f32.mrf.mxu1 }
 0x1e0   : > { %v961_v46 = vmax.f32 %v959_v45, %v960_v7  ;;  %v969_v17 = vrot.slane %v968_v9, 1  ;;  %v972_v40 = vmax.f32 %v971_v10, %v2219_v18  ;;  %v2245_v63 = vadd.f32 %v875_v29, %v2125_v0 }
 0x1e1   : > { %v1007_v21 = vsub.f32 %v2131_v55, %v943_v13  ;;  %v1015_v22 = vsub.f32 %v2123_v27, %v943_v13  ;;  %v1023_v23 = vsub.f32 %v2137_v57, %v943_v13  ;;  %v1031_v24 = vsub.f32 %v2170_v8, %v943_v13  ;;  %v877_v38 = vpop.f32.mrf.mxu0  ;;  %v930_v42 = vpop.f32.mrf.mxu1 }
 0x1e2   : > { %v1009_v25 = vsub.f32 %v2140_v60, %v961_v46  ;;  %v1017_v50 = vsub.f32 %v2128_v52, %v961_v46  ;;  %v1025_v26 = vsub.f32 %v2146_v62, %v961_v46  ;;  %v952_v2 = vmax.f32 %v950_v3, %v951_v14 }
 0x1e3   : > { %v1039_v32 = vmul.f32 1.442695, %v1007_v21  ;;  %v1055_v33 = vmul.f32 1.442695, %v1015_v22  ;;  %v1071_v55 = vmul.f32 1.442695, %v1023_v23  ;;  %v1033_v57 = vsub.f32 %v2176_v12, %v961_v46  ;;  %v932_v5 = vpop.f32.mrf.mxu1 }
 0x1e4   : > { %v1087_v27 = vmul.f32 1.442695, %v1031_v24  ;;  %v970_v35 = vmax.f32 %v968_v9, %v969_v17  ;;  %v998_v60 = vmax.f32 %v2206_v54, %v2216_v43  ;;  %v1043_v52 = vmul.f32 1.442695, %v1009_v25 }
 0x1e5   : > { %1700 = vpow2.f32 %v1039_v32  ;;  %v1059_v8 = vmul.f32 1.442695, %v1017_v50  ;;  %v1008_v62 = vsub.f32 %v2149_v1, %v952_v2  ;;  %v1016_v36 = vsub.f32 %v2134_v56, %v952_v2 }
 0x1e6   : > { %1702 = vpow2.f32 %v1055_v33  ;;  %v1024_v37 = vsub.f32 %v2154_v4, %v952_v2  ;;  %v1032_v31 = vsub.f32 %v2181_v16, %v952_v2  ;;  %v1075_v12 = vmul.f32 1.442695, %v1025_v26 }
 0x1e7   : > { %1704 = vpow2.f32 %v1071_v55  ;;  %v1010_v47 = vsub.f32 %v2159_v44, %v970_v35  ;;  %v1091_v49 = vmul.f32 1.442695, %v1033_v57  ;;  %v1041_v45 = vmul.f32 1.442695, %v1008_v62  ;;  %v879_v44 = vpop.f32.mrf.mxu0 }
 0x1e8   : > { %1706 = vpow2.f32 %v1087_v27  ;;  %v990_v1 = vmax.f32 %v989_v15, %v2222_v20  ;;  %v1057_v51 = vmul.f32 1.442695, %v1016_v36  ;;  %v1073_v56 = vmul.f32 1.442695, %v1024_v37 }
 0x1e9   : > { %1708 = vpow2.f32 %v1043_v52  ;;  %v1018_v4 = vsub.f32 %v2143_v61, %v970_v35  ;;  %v1089_v16 = vmul.f32 1.442695, %v1032_v31  ;;  %v2248_v3 = vadd.f32 %v928_v30, %v2125_v0 }
 0x1ea   : > { %1710 = vpow2.f32 %v1059_v8  ;;  %v1026_v6 = vsub.f32 %v2164_v58, %v970_v35  ;;  %v1045_v7 = vmul.f32 1.442695, %v1010_v47  ;;  %v2252_v9 = vadd.f32 %v877_v38, %v2156_v34 }
 0x1eb   : > { %1712 = vpow2.f32 %v1075_v12  ;;  %v981_v61 = vmax.f32 %v980_v28, %v2245_v63  ;;  %v999_v10 = vmax.f32 %v998_v60, %v2248_v3  ;;  %v2257_v13 = vadd.f32 %v930_v42, %v2156_v34 }
 0x1ec   : > { %1714 = vpow2.f32 %v1091_v49  ;;  %v973_v0 = vmax.f32 %v972_v40, %v2252_v9  ;;  %v2261_v14 = vadd.f32 %v879_v44, %v2156_v34  ;;  %v2264_v58 = vadd.f32 %v932_v5, %v2156_v34 }
 0x1ed   : > { %1716 = vpow2.f32 %v1041_v45  ;;  %v1034_v15 = vsub.f32 %v2186_v19, %v970_v35  ;;  %v1061_v46 = vmul.f32 1.442695, %v1018_v4  ;;  %v991_v17 = vmax.f32 %v990_v1, %v2257_v13 }
 0x1ee   : > { %1718 = vpow2.f32 %v1057_v51  ;;  %v974_v21 = vrot.slane %v973_v0, 4  ;;  %v982_v22 = vmax.f32 %v981_v61, %v2261_v14  ;;  %v1000_v23 = vmax.f32 %v999_v10, %v2264_v58 }
 0x1ef   : > { %1720 = vpow2.f32 %v1073_v56  ;;  %v1077_v24 = vmul.f32 1.442695, %v1026_v6  ;;  %v992_v25 = vrot.slane %v991_v17, 4  ;;  %v1093_v19 = vmul.f32 1.442695, %v1034_v15 }
 0x1f0   : > { %1722 = vpow2.f32 %v1089_v16  ;;  %v975_v50 = vmax.f32 %v973_v0, %v974_v21  ;;  %v983_v26 = vrot.slane %v982_v22, 4  ;;  %v1001_v34 = vrot.slane %v1000_v23, 4 }
 0x1f1   : > { %1724 = vpow2.f32 %v1045_v7  ;;  %v993_v29 = vmax.f32 %v991_v17, %v992_v25 }
 0x1f2   : > { %v2270_v28 = vpop.eup %1700  ;;  %1726 = vpow2.f32 %v1061_v46  ;;  %v976_v32 = vrot.slane %v975_v50, 2  ;;  %v984_v33 = vmax.f32 %v982_v22, %v983_v26  ;;  %v1002_v55 = vmax.f32 %v1000_v23, %v1001_v34 }
 0x1f3   : > { %v2272_v30 = vpop.eup %1702  ;;  %1728 = vpow2.f32 %v1077_v24  ;;  %v994_v57 = vrot.slane %v993_v29, 2 }
 0x1f4   : > { %v2274_v2 = vpop.eup %1704  ;;  %v1103_v27 = vadd.f32 %v2272_v30, %v2270_v28  ;;  %v977_v60 = vmax.f32 %v975_v50, %v976_v32  ;;  %v985_v52 = vrot.slane %v984_v33, 2  ;;  %1730 = vpow2.f32 %v1093_v19 }
 0x1f5   : > { %v2278_v35 = vpop.eup %1706  ;;  %v995_v36 = vmax.f32 %v993_v29, %v994_v57  ;;  %v1003_v37 = vrot.slane %v1002_v55, 2 }
 0x1f6   : > { %v2280_v8 = vpop.eup %1708  ;;  %v1104_v62 = vadd.f32 %v2274_v2, %v1103_v27  ;;  %v978_v38 = vrot.slane %v977_v60, 1  ;;  %v986_v42 = vmax.f32 %v984_v33, %v985_v52 }
 0x1f7   : > { %v2283_v31 = vpop.eup %1710  ;;  %v996_v49 = vrot.slane %v995_v36, 1  ;;  %v1004_v44 = vmax.f32 %v1002_v55, %v1003_v37 }
 0x1f8   : > { %v2285_v12 = vpop.eup %1712  ;;  %v1105_v47 = vadd.f32 %v2278_v35, %v1104_v62  ;;  %v1121_v40 = vadd.f32 %v2283_v31, %v2280_v8  ;;  %v979_v1 = vmax.f32 %v977_v60, %v978_v38  ;;  %v987_v10 = vrot.slane %v986_v42, 1 }
 0x1f9   : > { %v2290_v45 = vpop.eup %1714  ;;  %v997_v16 = vmax.f32 %v995_v36, %v996_v49  ;;  %v1005_v34 = vrot.slane %v1004_v44, 1 }
 0x1fa   : > { %v2292_v51 = vpop.eup %1716  ;;  %v1106_v56 = vrot.slane %v1105_v47, 4  ;;  %v1122_v4 = vadd.f32 %v2285_v12, %v1121_v40  ;;  %v1011_v6 = vsub.f32 %v2197_v53, %v979_v1  ;;  %v1019_v7 = vsub.f32 %v2191_v41, %v979_v1 }
 0x1fb   : > { %v2295_v5 = vpop.eup %1718  ;;  %v1027_v61 = vsub.f32 %v2219_v18, %v979_v1  ;;  %v1035_v21 = vsub.f32 %v2252_v9, %v979_v1  ;;  %v1013_v53 = vsub.f32 %v2200_v59, %v997_v16  ;;  %v1021_v41 = vsub.f32 %v2194_v48, %v997_v16 }
 0x1fc   : > { %v2300_v0 = vpop.eup %1720  ;;  %v1107_v15 = vadd.f32 %v1106_v56, %v1105_v47  ;;  %v1123_v46 = vadd.f32 %v2290_v45, %v1122_v4  ;;  %v1112_v17 = vadd.f32 %v2295_v5, %v2292_v51  ;;  %v1047_v23 = vmul.f32 1.442695, %v1011_v6 }
 0x1fd   : > { %v2306_v22 = vpop.eup %1722  ;;  %v1063_v24 = vmul.f32 1.442695, %v1019_v7  ;;  %v1079_v29 = vmul.f32 1.442695, %v1027_v61  ;;  %v1029_v9 = vsub.f32 %v2222_v20, %v997_v16  ;;  %v1037_v32 = vsub.f32 %v2257_v13, %v997_v16 }
 0x1fe   : > { %v2310_v18 = vpop.eup %1724  ;;  %v1108_v25 = vrot.slane %v1107_v15, 2  ;;  %v1124_v50 = vrot.slane %v1123_v46, 4  ;;  %v1113_v26 = vadd.f32 %v2300_v0, %v1112_v17  ;;  %1732 = vpow2.f32 %v1047_v23 }
 0x1ff   : > { %v2313_v19 = vpop.eup %1726  ;;  %1734 = vpow2.f32 %v1063_v24  ;;  %v1095_v57 = vmul.f32 1.442695, %v1035_v21  ;;  %v1051_v60 = vmul.f32 1.442695, %v1013_v53  ;;  %v1067_v52 = vmul.f32 1.442695, %v1021_v41 }
 0x200   : > { %v1109_v33 = vadd.f32 %v1108_v25, %v1107_v15  ;;  %v1125_v55 = vadd.f32 %v1124_v50, %v1123_v46  ;;  %v1114_v59 = vadd.f32 %v2306_v22, %v1113_v26  ;;  %v1130_v48 = vadd.f32 %v2313_v19, %v2310_v18  ;;  %v2320_v27 = vpop.eup %1728 }
 0x201   : > { %v2323_v38 = vpop.eup %1730  ;;  %1736 = vpow2.f32 %v1079_v29  ;;  %v1083_v13 = vmul.f32 1.442695, %v1029_v9  ;;  %v1099_v47 = vmul.f32 1.442695, %v1037_v32  ;;  %v988_v40 = vmax.f32 %v986_v42, %v987_v10 }
 0x202   : > { %v1110_v62 = vrot.slane %v1109_v33, 1  ;;  %v1126_v36 = vrot.slane %v1125_v55, 2  ;;  %v1115_v37 = vrot.slane %v1114_v59, 4  ;;  %v1131_v20 = vadd.f32 %v2320_v27, %v1130_v48 }
 0x203   : > { %1738 = vpow2.f32 %v1095_v57  ;;  %v1012_v16 = vsub.f32 %v2203_v39, %v988_v40  ;;  %v1020_v6 = vsub.f32 %v2211_v11, %v988_v40  ;;  %v1006_v7 = vmax.f32 %v1004_v44, %v1005_v34 }
 0x204   : > { %v1111_v49 = vadd.f32 %v1110_v62, %v1109_v33  ;;  %v1127_v1 = vadd.f32 %v1126_v36, %v1125_v55  ;;  %v1116_v56 = vadd.f32 %v1115_v37, %v1114_v59  ;;  %v1132_v4 = vadd.f32 %v2323_v38, %v1131_v20 }
 0x205   : > { %v1028_v17 = vsub.f32 %v2245_v63, %v988_v40  ;;  %v1036_v42 = vsub.f32 %v2261_v14, %v988_v40  ;;  %v1049_v10 = vmul.f32 1.442695, %v1012_v16  ;;  %v1065_v53 = vmul.f32 1.442695, %v1020_v6 }
 0x206   : > { %1740 = vrcp.f32 %v1111_v49  ;;  %v1128_v61 = vrot.slane %v1127_v1, 1  ;;  %v1117_v15 = vrot.slane %v1116_v56, 2  ;;  %v1133_v46 = vrot.slane %v1132_v4, 4 }
 0x207   : > { %1742 = vpow2.f32 %v1051_v60  ;;  %v1014_v39 = vsub.f32 %v2206_v54, %v1006_v7  ;;  %v1081_v41 = vmul.f32 1.442695, %v1028_v17  ;;  %v1022_v25 = vsub.f32 %v2216_v43, %v1006_v7 }
 0x208   : > { %v1129_v21 = vadd.f32 %v1128_v61, %v1127_v1  ;;  %v1118_v23 = vadd.f32 %v1117_v15, %v1116_v56  ;;  %v1134_v24 = vadd.f32 %v1133_v46, %v1132_v4  ;;  %1744 = vpow2.f32 %v1067_v52 }
 0x209   : > { %1746 = vpow2.f32 %v1083_v13  ;;  %v1097_v26 = vmul.f32 1.442695, %v1036_v42  ;;  %v1030_v34 = vsub.f32 %v2248_v3, %v1006_v7  ;;  %v1053_v29 = vmul.f32 1.442695, %v1014_v39 }
 0x20a   : > { %1748 = vrcp.f32 %v1129_v21  ;;  %v1119_v11 = vrot.slane %v1118_v23, 1  ;;  %v1135_v44 = vrot.slane %v1134_v24, 2  ;;  %v1038_v43 = vsub.f32 %v2264_v58, %v1006_v7 }
 0x20b   : > { %1750 = vpow2.f32 %v1099_v47  ;;  %v2332_v50 = vpop.eup %1732  ;;  %v1069_v33 = vmul.f32 1.442695, %v1022_v25  ;;  %v1085_v3 = vmul.f32 1.442695, %v1030_v34 }
 0x20c   : > { %v1120_v63 = vadd.f32 %v1119_v11, %v1118_v23  ;;  %v1136_v14 = vadd.f32 %v1135_v44, %v1134_v24  ;;  %1752 = vpow2.f32 %v1049_v10  ;;  %v2335_v9 = vpop.eup %1734  ;;  %v1101_v62 = vmul.f32 1.442695, %v1038_v43 }
 0x20d   : > { %1754 = vpow2.f32 %v1065_v53  ;;  %v1139_v32 = vadd.f32 %v2335_v9, %v2332_v50 }
 0x20e   : > { %1756 = vrcp.f32 %v1120_v63  ;;  %v1137_v54 = vrot.slane %v1136_v14, 1  ;;  %v2340_v55 = vpop.eup %1736 }
 0x20f   : > { %1758 = vpow2.f32 %v1081_v41  ;;  %v1140_v48 = vadd.f32 %v2340_v55, %v1139_v32 }
 0x210   : > { %v1138_v59 = vadd.f32 %v1137_v54, %v1136_v14  ;;  %1760 = vpow2.f32 %v1097_v26  ;;  %v2343_v57 = vpop.eup %1738 }
 0x211   : > { %1762 = vpow2.f32 %v1053_v29  ;;  %v1141_v52 = vadd.f32 %v2343_v57, %v1140_v48 }
 0x212   : > { %1764 = vrcp.f32 %v1138_v59 }
 0x213   : > { %v1741_v60 = vpop.eup %1740  ;;  %1766 = vpow2.f32 %v1069_v33  ;;  %v1142_v37 = vrot.slane %v1141_v52, 4 }
 0x214   : > { %v2346_v36 = vpop.eup %1742  ;;  %1768 = vpow2.f32 %v1085_v3  ;;  %v1183_v6 = vmul.f32 %v1741_v60, %v2270_v28  ;;  %v1191_v7 = vmul.f32 %v1741_v60, %v2272_v30  ;;  %v1199_v61 = vmul.f32 %v1741_v60, %v2274_v2 }
 0x215   : > { %v2348_v58 = vpop.eup %1744  ;;  %v1143_v40 = vadd.f32 %v1142_v37, %v1141_v52  ;;  %1770 = vpow2.f32 %v1101_v62  ;;  %v1207_v46 = vmul.f32 %v1741_v60, %v2278_v35 }
 0x216   : > { %v2350_v20 = vpop.eup %1746  ;;  %v1157_v13 = vadd.f32 %v2348_v58, %v2346_v36 }
 0x217   : > { %v1749_v47 = vpop.eup %1748  ;;  %v1144_v56 = vrot.slane %v1143_v40, 2 }
 0x218   : > { %v2354_v49 = vpop.eup %1750  ;;  %v1158_v4 = vadd.f32 %v2350_v20, %v1157_v13  ;;  %v1185_v17 = vmul.f32 %v1749_v47, %v2280_v8  ;;  %v1193_v35 = vmul.f32 %v1749_v47, %v2283_v31  ;;  %v1201_v41 = vmul.f32 %v1749_v47, %v2285_v12 }
 0x219   : > { %v2356_v1 = vpop.eup %1752  ;;  %v1145_v8 = vadd.f32 %v1144_v56, %v1143_v40  ;;  %v1209_v25 = vmul.f32 %v1749_v47, %v2290_v45 }
 0x21a   : > { %v2359_v16 = vpop.eup %1754  ;;  %v1159_v42 = vadd.f32 %v2354_v49, %v1158_v4 }
 0x21b   : > { %v1757_v15 = vpop.eup %1756  ;;  %v1148_v10 = vadd.f32 %v2359_v16, %v2356_v1  ;;  %v1146_v45 = vrot.slane %v1145_v8, 1 }
 0x21c   : > { %v2369_v21 = vpop.eup %1758  ;;  %v1184_v23 = vmul.f32 %v1757_v15, %v2292_v51  ;;  %v1192_v28 = vmul.f32 %v1757_v15, %v2295_v5  ;;  %v1200_v30 = vmul.f32 %v1757_v15, %v2300_v0  ;;  %v1208_v2 = vmul.f32 %v1757_v15, %v2306_v22 }
 0x21d   : > { %v2375_v24 = vpop.eup %1760  ;;  %v1160_v51 = vrot.slane %v1159_v42, 4  ;;  %v1149_v5 = vadd.f32 %v2369_v21, %v1148_v10  ;;  %v1147_v37 = vadd.f32 %v1146_v45, %v1145_v8 }
 0x21e   : > { %v2386_v0 = vpop.eup %1762  ;;  %v1636_v22 = vpack.c.bf16 %v1184_v23, %v1183_v6  ;;  %v1640_v53 = vpack.c.bf16 %v1192_v28, %v1191_v7  ;;  %v1644_v39 = vpack.c.bf16 %v1200_v30, %v1199_v61  ;;  %v1648_v11 = vpack.c.bf16 %v1208_v2, %v1207_v46 }
 0x21f   : > { %v1765_v44 = vpop.eup %1764  ;;  %v1161_v63 = vadd.f32 %v1160_v51, %v1159_v42  ;;  %v1150_v31 = vadd.f32 %v2375_v24, %v1149_v5  ;;  %1772 = vrcp.f32 %v1147_v37 }
 0x220   : > { %v2391_v14 = vpop.eup %1766  ;;  %1311 = vst [vmem:[%s2382_s25] sm:$0xff] %v1636_v22  ;;  %1315 = vst [vmem:[%s2382_s25 + $0x20] sm:$0xff] %v1640_v53  ;;  %v1186_v26 = vmul.f32 %v1765_v44, %v2310_v18  ;;  %v1194_v34 = vmul.f32 %v1765_v44, %v2313_v19  ;;  %v1202_v29 = vmul.f32 %v1765_v44, %v2320_v27 }
 0x221   : > { %1319 = vst [vmem:[%s2382_s25 + $0x40] sm:$0xff] %v1644_v39  ;;  %1323 = vst [vmem:[%s2382_s25 + $0x60] sm:$0xff] %v1648_v11  ;;  %v1210_v12 = vmul.f32 %v1765_v44, %v2323_v38  ;;  %v1162_v54 = vrot.slane %v1161_v63, 2  ;;  %v1151_v32 = vrot.slane %v1150_v31, 4  ;;  %v1166_v43 = vadd.f32 %v2391_v14, %v2386_v0  ;;  %v1769_v33 = vpop.eup %1768 }
 0x222   : > { %v1637_v59 = vpack.c.bf16 %v1186_v26, %v1185_v17  ;;  %v1641_v48 = vpack.c.bf16 %v1194_v34, %v1193_v35  ;;  %v1645_v18 = vpack.c.bf16 %v1202_v29, %v1201_v41  ;;  %v1771_v52 = vpop.eup %1770 }
 0x223   : > { %v1649_v3 = vpack.c.bf16 %v1210_v12, %v1209_v25  ;;  %v1152_v60 = vadd.f32 %v1151_v32, %v1150_v31  ;;  %v1167_v19 = vadd.f32 %v1769_v33, %v1166_v43  ;;  %v1163_v27 = vadd.f32 %v1162_v54, %v1161_v63 }
 0x224   : > { %1312 = vst [vmem:[%s2382_s25 + $0x8] sm:$0xff] %v1637_v59  ;;  %1316 = vst [vmem:[%s2382_s25 + $0x28] sm:$0xff] %v1641_v48 }
 0x225   : > { %1320 = vst [vmem:[%s2382_s25 + $0x48] sm:$0xff] %v1645_v18  ;;  %1324 = vst [vmem:[%s2382_s25 + $0x68] sm:$0xff] %v1649_v3  ;;  %v1153_v38 = vrot.slane %v1152_v60, 2  ;;  %v1168_v62 = vadd.f32 %v1771_v52, %v1167_v19  ;;  %v1164_v40 = vrot.slane %v1163_v27, 1 }
 0x227   : > { %v1154_v13 = vadd.f32 %v1153_v38, %v1152_v60  ;;  %v1169_v47 = vrot.slane %v1168_v62, 4  ;;  %v1165_v61 = vadd.f32 %v1164_v40, %v1163_v27 }
 0x229   : > { %v1155_v56 = vrot.slane %v1154_v13, 1  ;;  %v1170_v4 = vadd.f32 %v1169_v47, %v1168_v62 }
 0x22b   : > { %v1156_v6 = vadd.f32 %v1155_v56, %v1154_v13  ;;  %v1171_v7 = vrot.slane %v1170_v4, 2 }
 0x22c   : > { %v1773_v42 = vpop.eup %1772 }
 0x22d   : > { %1774 = vrcp.f32 %v1156_v6  ;;  %v1172_v15 = vadd.f32 %v1171_v7, %v1170_v4  ;;  %v1187_v23 = vmul.f32 %v1773_v42, %v2332_v50  ;;  %v1195_v28 = vmul.f32 %v1773_v42, %v2335_v9 }
 0x22e   : > { %1776 = vrcp.f32 %v1165_v61  ;;  %v1203_v30 = vmul.f32 %v1773_v42, %v2340_v55  ;;  %v1211_v2 = vmul.f32 %v1773_v42, %v2343_v57 }
 0x22f   : > { %v1173_v46 = vrot.slane %v1172_v15, 1 }
 0x231   : > { %v1174_v17 = vadd.f32 %v1173_v46, %v1172_v15 }
 0x233   : > { %1778 = vrcp.f32 %v1174_v17 }
 0x23a   : > { %v1775_v10 = vpop.eup %1774 }
 0x23b   : > { %v1188_v35 = vmul.f32 %v1775_v10, %v2356_v1  ;;  %v1196_v8 = vmul.f32 %v1775_v10, %v2359_v16  ;;  %v1204_v51 = vmul.f32 %v1775_v10, %v2369_v21  ;;  %v1212_v5 = vmul.f32 %v1775_v10, %v2375_v24  ;;  %v1777_v50 = vpop.eup %1776 }
 0x23c   : > { %v1189_v55 = vmul.f32 %v1777_v50, %v2346_v36  ;;  %v1197_v57 = vmul.f32 %v1777_v50, %v2348_v58  ;;  %v1205_v1 = vmul.f32 %v1777_v50, %v2350_v20  ;;  %v1213_v16 = vmul.f32 %v1777_v50, %v2354_v49 }
 0x23d   : > { %v1638_v22 = vpack.c.bf16 %v1188_v35, %v1187_v23  ;;  %v1642_v53 = vpack.c.bf16 %v1196_v8, %v1195_v28  ;;  %v1646_v39 = vpack.c.bf16 %v1204_v51, %v1203_v30  ;;  %v1650_v11 = vpack.c.bf16 %v1212_v5, %v1211_v2 }
 0x23f   : > { %1313 = vst [vmem:[%s2382_s25 + $0x10] sm:$0xff] %v1638_v22  ;;  %1317 = vst [vmem:[%s2382_s25 + $0x30] sm:$0xff] %v1642_v53 }
 0x240   : > { %1321 = vst [vmem:[%s2382_s25 + $0x50] sm:$0xff] %v1646_v39  ;;  %1325 = vst [vmem:[%s2382_s25 + $0x70] sm:$0xff] %v1650_v11  ;;  %v1779_v9 = vpop.eup %1778 }
 0x241   : > { %v1190_v21 = vmul.f32 %v1779_v9, %v2386_v0  ;;  %v1198_v24 = vmul.f32 %v1779_v9, %v2391_v14  ;;  %v1206_v44 = vmul.f32 %v1779_v9, %v1769_v33  ;;  %v1214_v41 = vmul.f32 %v1779_v9, %v1771_v52 }
 0x243   : > { %v1639_v25 = vpack.c.bf16 %v1190_v21, %v1189_v55  ;;  %v1643_v63 = vpack.c.bf16 %v1198_v24, %v1197_v57  ;;  %v1647_v31 = vpack.c.bf16 %v1206_v44, %v1205_v1  ;;  %v1651_v26 = vpack.c.bf16 %v1214_v41, %v1213_v16 }
 0x245   : > { %1314 = vst [vmem:[%s2382_s25 + $0x18] sm:$0xff] %v1639_v25  ;;  %1318 = vst [vmem:[%s2382_s25 + $0x38] sm:$0xff] %v1643_v63 }
 0x246   : > { %1322 = vst [vmem:[%s2382_s25 + $0x58] sm:$0xff] %v1647_v31  ;;  %1326 = vst [vmem:[%s2382_s25 + $0x78] sm:$0xff] %v1651_v26 }
 0x247 PF: > { %s24_s8 = sadd.s32 1, %s1816_s8   ;;  %s2446_s29 = smov %s1812_s30 }
 0x248   : > { %p21_p10 = scmp.ge.s32.totalorder %s24_s8, 4   ;;  %s2447_s30 = smov %s2449_s0 }
 0x24a   :  { %23 = sbr.rel (!%p21_p10) target bundleno = 17 (0x11), region = 82 }

</bundles_post_ra>
